<compile_context>
chip_gen: v7x
topology: tpu7x:2x2x1
jax: 0.10.0
libtpu: 0.0.40
codegen_flags: <defaults>
</compile_context>

<pallas_src>
import jax
import jax.numpy as jnp
from jax.experimental import pallas as pl
from jax.experimental.pallas import tpu as pltpu


def _round_up(x, m):
    return (x + m - 1) // m * m


def _autoencoder_kernel(x_ref, w1_ref, b1_ref, w2_ref, b2_ref, out_ref):
    # x arrives f32 straight from HBM; cast to bf16 in-register right before
    # feeding the MXU (no wrapper-side cast pass over the activations).
    x = x_ref[...].astype(jnp.bfloat16)
    # encoder: h = relu(x @ W1 + b1)   (bf16 operands, f32 MXU accumulation)
    h = jnp.dot(x, w1_ref[...], preferred_element_type=jnp.float32)
    h = jnp.maximum(h + b1_ref[...], 0.0)
    # decoder: rec = sigmoid(h @ W2 + b2)
    r = jnp.dot(h.astype(w2_ref.dtype), w2_ref[...],
                preferred_element_type=jnp.float32)
    r = r + b2_ref[...]
    # NOTE: kernel is HBM-bound on v5e/v6e/v7x; if the epilogue ever becomes
    # exposed (v7x), replace with exp(-r) + pl.reciprocal(1+e, approx=True).
    out_ref[...] = jax.nn.sigmoid(r).astype(out_ref.dtype)


def _weight_spec(shape, weight_mode):
    # Constant index map => DMA'd once, VMEM-resident across grid steps.
    if weight_mode is None:
        return pl.BlockSpec(shape, lambda i: (0, 0))
    return pl.BlockSpec(shape, lambda i: (0, 0), pipeline_mode=weight_mode)


def autoencoder_forward(x_nchw, w1, b1, w2, b2, *, block_b=512,
                        out_dtype=jnp.float32):
    """Autoencoder.forward: decoder(encoder(x)).

    x_nchw: [B, C, H, W] f32, w1: [D, HID], b1: [1, HID] (or [HID]),
    w2: [HID, D], b2: [1, D] (or [D]), with D = C*H*W.
    Returns the reconstruction [B, C, H, W] in `out_dtype` (default float32,
    matching the original module; bf16 halves the output HBM stream).
    """
    B, C, H, W = x_nchw.shape
    D = C * H * W
    HID = w1.shape[1]

    b1 = b1.reshape(1, -1)
    b2 = b2.reshape(1, -1)

    # --- pad hidden dim to a lane-dense multiple of 128 (exact: zero pads) ---
    HIDP = _round_up(max(HID, 128), 128)
    if HIDP != HID:
        w1 = jnp.pad(w1, ((0, 0), (0, HIDP - HID)))
        b1 = jnp.pad(b1, ((0, 0), (0, HIDP - HID)))
        w2 = jnp.pad(w2, ((0, HIDP - HID), (0, 0)))

    # --- batch tiling -------------------------------------------------------
    # Balanced tiles (multiple of 16 for bf16 sublane packing) with minimal
    # padding, and >= 2 grid steps whenever B > 16 so the "parallel" batch
    # axis can be sharded across both TensorCores on v7x.
    n_tiles = max(pl.cdiv(B, block_b), 2 if B > 16 else 1)
    TM = _round_up(pl.cdiv(B, n_tiles), 16)
    BP = _round_up(B, TM)

    x_flat = x_nchw.reshape(B, D)                 # layout no-op; x stays f32
    if BP != B:
        x_flat = jnp.pad(x_flat, ((0, BP - B), (0, 0)))  # single pad pass only

    # Weights to bf16 (tiny one-time cast; in practice params are pre-cast),
    # biases & accumulation stay f32.
    w1_bf = w1.astype(jnp.bfloat16)
    w2_bf = w2.astype(jnp.bfloat16)
    b1_f = b1.astype(jnp.float32)
    b2_f = b2.astype(jnp.float32)

    grid = (BP // TM,)
    out_bytes = jnp.dtype(out_dtype).itemsize

    cost = pl.CostEstimate(
        flops=2 * BP * D * HIDP * 2,              # two matmuls
        transcendentals=BP * D,                   # sigmoid
        bytes_accessed=(BP * D * 4                # x read (f32)
                        + (w1_bf.size + w2_bf.size) * 2
                        + (b1_f.size + b2_f.size) * 4
                        + BP * D * out_bytes),    # reconstruction write
    )

    def _call(weight_mode, wbuf):
        # VMEM request sized from real buffer counts: weights x wbuf,
        # x/out tiles x2 (double-buffered pipeline), plus in-kernel
        # intermediates (bf16 x copy, f32 h, bf16 h, f32 pre-sigmoid).
        weight_bytes = wbuf * ((w1_bf.size + w2_bf.size) * 2
                               + (b1_f.size + b2_f.size) * 4)
        io_bytes = 2 * TM * D * 4 + 2 * TM * D * out_bytes
        interm_bytes = TM * D * 2 + TM * HIDP * 6 + TM * D * 4
        vmem_limit = int(min(
            max(int(1.4 * (weight_bytes + io_bytes + interm_bytes)), 8 << 20),
            56 << 20))                            # headroom under v7x's 64 MiB

        return pl.pallas_call(
            _autoencoder_kernel,
            out_shape=jax.ShapeDtypeStruct((BP, D), out_dtype),
            grid=grid,
            in_specs=[
                pl.BlockSpec((TM, D), lambda i: (i, 0)),     # x tile (pipelined)
                _weight_spec((D, HIDP), weight_mode),        # W1 (resident)
                _weight_spec((1, HIDP), weight_mode),        # b1 (resident)
                _weight_spec((HIDP, D), weight_mode),        # W2 (resident)
                _weight_spec((1, D), weight_mode),           # b2 (resident)
            ],
            out_specs=pl.BlockSpec((TM, D), lambda i: (i, 0)),  # lane-dense D
            compiler_params=pltpu.CompilerParams(
                dimension_semantics=("parallel",),           # megacore on v7x
                vmem_limit_bytes=vmem_limit,
            ),
            cost_estimate=cost,
        )(x_flat, w1_bf, b1_f, w2_bf, b2_f)

    # Prefer single-buffered resident weights (pl.Buffered(1)); fall back to
    # the default double-buffered pipeline if this JAX/Mosaic rejects it.
    try:
        rec_flat = _call(pl.Buffered(1), 1)
    except Exception:  # pragma: no cover - graceful degradation only
        rec_flat = _call(None, 2)

    return rec_flat[:B].reshape(B, C, H, W)


def _reference_f32(x_nchw, w1, b1, w2, b2):
    """Original full-f32 module semantics."""
    B = x_nchw.shape[0]
    x = x_nchw.reshape(B, -1)
    h = jnp.maximum(x @ w1 + b1.reshape(1, -1), 0.0)
    r = jax.nn.sigmoid(h @ w2 + b2.reshape(1, -1))
    return r.reshape(x_nchw.shape)


def _reference_bf16(x_nchw, w1, b1, w2, b2):
    """Mirror of the kernel math (bf16 operands, f32 accumulation)."""
    B = x_nchw.shape[0]
    x = x_nchw.reshape(B, -1).astype(jnp.bfloat16)
    h = jnp.dot(x, w1.astype(jnp.bfloat16), preferred_element_type=jnp.float32)
    h = jnp.maximum(h + b1.reshape(1, -1), 0.0)
    r = jnp.dot(h.astype(jnp.bfloat16), w2.astype(jnp.bfloat16),
                preferred_element_type=jnp.float32)
    r = jax.nn.sigmoid(r + b2.reshape(1, -1))
    return r.reshape(x_nchw.shape)


if __name__ == "__main__":
    B, C, H, W = 2, 4, 16, 16
    D = C * H * W
    HIDDEN = 32

    key = jax.random.PRNGKey(0)
    kx, kw1, kb1, kw2, kb2 = jax.random.split(key, 5)

    x = jax.random.normal(kx, (B, C, H, W), dtype=jnp.float32)
    # Deterministic parameter init (synthetic weights, no checkpoint load).
    w1 = jax.random.normal(kw1, (D, HIDDEN), dtype=jnp.float32) * 0.02
    b1 = jax.random.normal(kb1, (1, HIDDEN), dtype=jnp.float32) * 0.01
    w2 = jax.random.normal(kw2, (HIDDEN, D), dtype=jnp.float32) * 0.02
    b2 = jax.random.normal(kb2, (1, D), dtype=jnp.float32) * 0.01

    # Default path: f32 output (original module contract).
    rec = autoencoder_forward(x, w1, b1, w2, b2)
    rec = jax.block_until_ready(rec)
    assert rec.shape == (B, C, H, W)
    assert rec.dtype == jnp.float32

    # Tight check vs. a reference that mirrors the kernel math (bf16 / f32 acc).
    ref_bf = _reference_bf16(x, w1, b1, w2, b2)
    assert jnp.allclose(rec, ref_bf, atol=1e-3, rtol=1e-3)

    # Loose check vs. the original full-f32 module (bf16 weight quantization).
    ref_f32 = _reference_f32(x, w1, b1, w2, b2)
    assert jnp.allclose(rec, ref_f32, atol=3e-2, rtol=3e-2)

    # Optional bandwidth-saving path from the perf review: bf16 reconstruction
    # (halves the output HBM stream for callers that accept bf16).
    rec_bf16 = autoencoder_forward(x, w1, b1, w2, b2, out_dtype=jnp.bfloat16)
    rec_bf16 = jax.block_until_ready(rec_bf16)
    assert rec_bf16.dtype == jnp.bfloat16
    assert jnp.allclose(rec_bf16.astype(jnp.float32), ref_f32,
                        atol=3e-2, rtol=3e-2)

    print("KERNEL_OK")
</pallas_src>

<mosaic_0001>
module attributes {stable_mosaic.version = 11 : i64} {
  func.func @_autoencoder_kernel(%arg0: i32, %arg1: memref<16x1024xf32, #tpu.memory_space<vmem>>, %arg2: memref<1024x128xbf16, #tpu.memory_space<vmem>>, %arg3: memref<1x128xf32, #tpu.memory_space<vmem>>, %arg4: memref<128x1024xbf16, #tpu.memory_space<vmem>>, %arg5: memref<1x1024xf32, #tpu.memory_space<vmem>>, %arg6: memref<16x1024xf32, #tpu.memory_space<vmem>>) attributes {dimension_semantics = [#tpu.dimension_semantics<parallel>], iteration_bounds = array<i64: 1>, scalar_prefetch = 0 : i64, scratch_operands = 0 : i64, tpu.core_type = #tpu.core_type<tc>, window_params = [{transform_indices = @transform_0, window_bounds = array<i64: 16, 1024>}, {pipeline_mode = #tpu.pipeline_mode<synchronous>, transform_indices = @transform_1, window_bounds = array<i64: 1024, 128>}, {pipeline_mode = #tpu.pipeline_mode<synchronous>, transform_indices = @transform_2, window_bounds = array<i64: 1, 128>}, {pipeline_mode = #tpu.pipeline_mode<synchronous>, transform_indices = @transform_3, window_bounds = array<i64: 128, 1024>}, {pipeline_mode = #tpu.pipeline_mode<synchronous>, transform_indices = @transform_4, window_bounds = array<i64: 1, 1024>}, {transform_indices = @transform_5, window_bounds = array<i64: 16, 1024>}]} {
    %c0 = arith.constant 0 : index
    %c0_0 = arith.constant 0 : index
    %0 = vector.load %arg1[%c0, %c0_0] : memref<16x1024xf32, #tpu.memory_space<vmem>>, vector<16x1024xf32>
    %1 = arith.truncf %0 : vector<16x1024xf32> to vector<16x1024xbf16>
    %c0_1 = arith.constant 0 : index
    %c0_2 = arith.constant 0 : index
    %2 = vector.load %arg2[%c0_1, %c0_2] : memref<1024x128xbf16, #tpu.memory_space<vmem>>, vector<1024x128xbf16>
    %cst = arith.constant dense<0.000000e+00> : vector<16x128xf32>
    %3 = tpu.matmul %1, %2, %cst {dimension_numbers = #tpu.dot_dimension_numbers<[1], [0], [0], [1], [0, 0, 1, 1], [], []>} : vector<16x1024xbf16>, vector<1024x128xbf16>, vector<16x128xf32> -> vector<16x128xf32>
    %c0_3 = arith.constant 0 : index
    %c0_4 = arith.constant 0 : index
    %4 = vector.load %arg3[%c0_3, %c0_4] : memref<1x128xf32, #tpu.memory_space<vmem>>, vector<1x128xf32>
    %5 = vector.broadcast %4 : vector<1x128xf32> to vector<16x128xf32>
    %6 = arith.addf %3, %5 : vector<16x128xf32>
    %cst_5 = arith.constant 0.000000e+00 : f32
    %7 = vector.broadcast %cst_5 : f32 to vector<16x128xf32>
    %8 = arith.maximumf %6, %7 : vector<16x128xf32>
    %9 = arith.truncf %8 : vector<16x128xf32> to vector<16x128xbf16>
    %c0_6 = arith.constant 0 : index
    %c0_7 = arith.constant 0 : index
    %10 = vector.load %arg4[%c0_6, %c0_7] : memref<128x1024xbf16, #tpu.memory_space<vmem>>, vector<128x1024xbf16>
    %cst_8 = arith.constant dense<0.000000e+00> : vector<16x1024xf32>
    %11 = tpu.matmul %9, %10, %cst_8 {dimension_numbers = #tpu.dot_dimension_numbers<[1], [0], [0], [1], [0, 0, 1, 1], [], []>} : vector<16x128xbf16>, vector<128x1024xbf16>, vector<16x1024xf32> -> vector<16x1024xf32>
    %c0_9 = arith.constant 0 : index
    %c0_10 = arith.constant 0 : index
    %12 = vector.load %arg5[%c0_9, %c0_10] : memref<1x1024xf32, #tpu.memory_space<vmem>>, vector<1x1024xf32>
    %13 = vector.broadcast %12 : vector<1x1024xf32> to vector<16x1024xf32>
    %14 = arith.addf %11, %13 : vector<16x1024xf32>
    %15 = arith.negf %14 : vector<16x1024xf32>
    %16 = math.exp %15 : vector<16x1024xf32>
    %cst_11 = arith.constant 1.000000e+00 : f32
    %17 = vector.broadcast %cst_11 : f32 to vector<16x1024xf32>
    %18 = arith.addf %17, %16 : vector<16x1024xf32>
    %19 = arith.divf %17, %18 : vector<16x1024xf32>
    %c0_12 = arith.constant 0 : index
    %c0_13 = arith.constant 0 : index
    %20 = vector.load %arg6[%c0_12, %c0_13] : memref<16x1024xf32, #tpu.memory_space<vmem>>, vector<16x1024xf32>
    tpu.vector_store %arg6[%c0_12, %c0_13], %19 {strides = array<i32>} : memref<16x1024xf32, #tpu.memory_space<vmem>>, vector<16x1024xf32>,
    return
  }
  func.func @transform_0(%arg0: i32) -> (i32, i32) {
    %c0_i32 = arith.constant 0 : i32
    %c0_i32_0 = arith.constant 0 : i32
    return %arg0, %c0_i32 : i32, i32
  }
  func.func @transform_1(%arg0: i32) -> (i32, i32) {
    %c0_i32 = arith.constant 0 : i32
    %c0_i32_0 = arith.constant 0 : i32
    %c0_i32_1 = arith.constant 0 : i32
    return %c0_i32, %c0_i32_0 : i32, i32
  }
  func.func @transform_2(%arg0: i32) -> (i32, i32) {
    %c0_i32 = arith.constant 0 : i32
    %c0_i32_0 = arith.constant 0 : i32
    %c0_i32_1 = arith.constant 0 : i32
    return %c0_i32, %c0_i32_0 : i32, i32
  }
  func.func @transform_3(%arg0: i32) -> (i32, i32) {
    %c0_i32 = arith.constant 0 : i32
    %c0_i32_0 = arith.constant 0 : i32
    %c0_i32_1 = arith.constant 0 : i32
    return %c0_i32, %c0_i32_0 : i32, i32
  }
  func.func @transform_4(%arg0: i32) -> (i32, i32) {
    %c0_i32 = arith.constant 0 : i32
    %c0_i32_0 = arith.constant 0 : i32
    %c0_i32_1 = arith.constant 0 : i32
    return %c0_i32, %c0_i32_0 : i32, i32
  }
  func.func @transform_5(%arg0: i32) -> (i32, i32) {
    %c0_i32 = arith.constant 0 : i32
    %c0_i32_0 = arith.constant 0 : i32
    return %arg0, %c0_i32 : i32, i32
  }
}

module attributes {stable_mosaic.version = 11 : i64} {
  func.func @_autoencoder_kernel(%arg0: i32, %arg1: memref<16x1024xf32, #tpu.memory_space<vmem>>, %arg2: memref<1024x128xbf16, #tpu.memory_space<vmem>>, %arg3: memref<1x128xf32, #tpu.memory_space<vmem>>, %arg4: memref<128x1024xbf16, #tpu.memory_space<vmem>>, %arg5: memref<1x1024xf32, #tpu.memory_space<vmem>>, %arg6: memref<16x1024xf32, #tpu.memory_space<vmem>>) attributes {dimension_semantics = [#tpu.dimension_semantics<parallel>], iteration_bounds = array<i64: 1>, scalar_prefetch = 0 : i64, scratch_operands = 0 : i64, tpu.core_type = #tpu.core_type<tc>, window_params = [{transform_indices = @transform_0, window_bounds = array<i64: 16, 1024>}, {pipeline_mode = #tpu.pipeline_mode<synchronous>, transform_indices = @transform_1, window_bounds = array<i64: 1024, 128>}, {pipeline_mode = #tpu.pipeline_mode<synchronous>, transform_indices = @transform_2, window_bounds = array<i64: 1, 128>}, {pipeline_mode = #tpu.pipeline_mode<synchronous>, transform_indices = @transform_3, window_bounds = array<i64: 128, 1024>}, {pipeline_mode = #tpu.pipeline_mode<synchronous>, transform_indices = @transform_4, window_bounds = array<i64: 1, 1024>}, {transform_indices = @transform_5, window_bounds = array<i64: 16, 1024>}]} {
    %c0 = arith.constant 0 : index
    %c0_0 = arith.constant 0 : index
    %0 = vector.load %arg1[%c0, %c0_0] : memref<16x1024xf32, #tpu.memory_space<vmem>>, vector<16x1024xf32>
    %1 = arith.truncf %0 : vector<16x1024xf32> to vector<16x1024xbf16>
    %c0_1 = arith.constant 0 : index
    %c0_2 = arith.constant 0 : index
    %2 = vector.load %arg2[%c0_1, %c0_2] : memref<1024x128xbf16, #tpu.memory_space<vmem>>, vector<1024x128xbf16>
    %cst = arith.constant dense<0.000000e+00> : vector<16x128xf32>
    %3 = tpu.matmul %1, %2, %cst {dimension_numbers = #tpu.dot_dimension_numbers<[1], [0], [0], [1], [0, 0, 1, 1], [], []>} : vector<16x1024xbf16>, vector<1024x128xbf16>, vector<16x128xf32> -> vector<16x128xf32>
    %c0_3 = arith.constant 0 : index
    %c0_4 = arith.constant 0 : index
    %4 = vector.load %arg3[%c0_3, %c0_4] : memref<1x128xf32, #tpu.memory_space<vmem>>, vector<1x128xf32>
    %5 = vector.broadcast %4 : vector<1x128xf32> to vector<16x128xf32>
    %6 = arith.addf %3, %5 : vector<16x128xf32>
    %cst_5 = arith.constant 0.000000e+00 : f32
    %7 = vector.broadcast %cst_5 : f32 to vector<16x128xf32>
    %8 = arith.maximumf %6, %7 : vector<16x128xf32>
    %9 = arith.truncf %8 : vector<16x128xf32> to vector<16x128xbf16>
    %c0_6 = arith.constant 0 : index
    %c0_7 = arith.constant 0 : index
    %10 = vector.load %arg4[%c0_6, %c0_7] : memref<128x1024xbf16, #tpu.memory_space<vmem>>, vector<128x1024xbf16>
    %cst_8 = arith.constant dense<0.000000e+00> : vector<16x1024xf32>
    %11 = tpu.matmul %9, %10, %cst_8 {dimension_numbers = #tpu.dot_dimension_numbers<[1], [0], [0], [1], [0, 0, 1, 1], [], []>} : vector<16x128xbf16>, vector<128x1024xbf16>, vector<16x1024xf32> -> vector<16x1024xf32>
    %c0_9 = arith.constant 0 : index
    %c0_10 = arith.constant 0 : index
    %12 = vector.load %arg5[%c0_9, %c0_10] : memref<1x1024xf32, #tpu.memory_space<vmem>>, vector<1x1024xf32>
    %13 = vector.broadcast %12 : vector<1x1024xf32> to vector<16x1024xf32>
    %14 = arith.addf %11, %13 : vector<16x1024xf32>
    %15 = arith.negf %14 : vector<16x1024xf32>
    %16 = math.exp %15 : vector<16x1024xf32>
    %cst_11 = arith.constant 1.000000e+00 : f32
    %17 = vector.broadcast %cst_11 : f32 to vector<16x1024xf32>
    %18 = arith.addf %17, %16 : vector<16x1024xf32>
    %19 = arith.divf %17, %18 : vector<16x1024xf32>
    %c0_12 = arith.constant 0 : index
    %c0_13 = arith.constant 0 : index
    %20 = vector.load %arg6[%c0_12, %c0_13] : memref<16x1024xf32, #tpu.memory_space<vmem>>, vector<16x1024xf32>
    tpu.vector_store %arg6[%c0_12, %c0_13], %19 {strides = array<i32>} : memref<16x1024xf32, #tpu.memory_space<vmem>>, vector<16x1024xf32>,
    return
  }
  func.func @transform_0(%arg0: i32) -> (i32, i32) {
    %c0_i32 = arith.constant 0 : i32
    %c0_i32_0 = arith.constant 0 : i32
    return %arg0, %c0_i32 : i32, i32
  }
  func.func @transform_1(%arg0: i32) -> (i32, i32) {
    %c0_i32 = arith.constant 0 : i32
    %c0_i32_0 = arith.constant 0 : i32
    %c0_i32_1 = arith.constant 0 : i32
    return %c0_i32, %c0_i32_0 : i32, i32
  }
  func.func @transform_2(%arg0: i32) -> (i32, i32) {
    %c0_i32 = arith.constant 0 : i32
    %c0_i32_0 = arith.constant 0 : i32
    %c0_i32_1 = arith.constant 0 : i32
    return %c0_i32, %c0_i32_0 : i32, i32
  }
  func.func @transform_3(%arg0: i32) -> (i32, i32) {
    %c0_i32 = arith.constant 0 : i32
    %c0_i32_0 = arith.constant 0 : i32
    %c0_i32_1 = arith.constant 0 : i32
    return %c0_i32, %c0_i32_0 : i32, i32
  }
  func.func @transform_4(%arg0: i32) -> (i32, i32) {
    %c0_i32 = arith.constant 0 : i32
    %c0_i32_0 = arith.constant 0 : i32
    %c0_i32_1 = arith.constant 0 : i32
    return %c0_i32, %c0_i32_0 : i32, i32
  }
  func.func @transform_5(%arg0: i32) -> (i32, i32) {
    %c0_i32 = arith.constant 0 : i32
    %c0_i32_0 = arith.constant 0 : i32
    return %arg0, %c0_i32 : i32, i32
  }
}

</mosaic_0001>

<bundles_post_ra>
// kernel: tpu_custom_call.1
= control target key start
LH: loop header
LB: loop body
LE: loop exit
PB: predicated region body
PF: predicated region fallthrough
CT: control target
= control target key end

     0   :  { %10 = vsyncpa [#allocation3], 0  ;;  %s2098_s0 = inlined_call_operand.hbm [shape: f32[16,1024], index: 0, kind: input, shape index: {}]   ;;  %s2099_s1 = inlined_call_operand.hbm [shape: bf16[1024,128], index: 1, kind: input, shape index: {}]   ;;  %s2100_s2 = inlined_call_operand.vmem [shape: f32[1,128], index: 2, kind: input, shape index: {}]   ;;  %s2101_s3 = inlined_call_operand.hbm [shape: bf16[128,1024], index: 3, kind: input, shape index: {}]   ;;  %s2102_s4 = inlined_call_operand.vmem [shape: f32[1,1024], index: 4, kind: input, shape index: {}]   ;;  %s2103_s5 = inlined_call_operand.hbm [shape: f32[16,1024], index: 5, kind: output, shape index: {}]  }
   0x1   :  { %11 = vsyncpa [#allocation6], 0 }
   0x2   :  { %12 = vsyncpa [#allocation4], 0  ;;  %s1966_s18 = smov [#allocation5]   ;;  %s1872_s22 = scalar_lea.hbm %s2099_s1, 8192 }
   0x3   :  { %s30_s19 = sshll.u32 %s1966_s18, 4  ;;  %p1873_p0 = scmp.ne.s32.totalorder %s2099_s1, %s1872_s22  ;;  %s31_s19 = int_to_ptr.vmem [resolvable:$true] %s30_s19 }
   0x4   :  { %p1876_p1 = scmp.lt.u32.totalorder %s1872_s22, %s2099_s1 }
   0x6   :  { %p1878_p2 = pnand %p1876_p1, %p1873_p0 }
   0x8   :  { %1881 = shalt.err (!%p1878_p2)
}
   0x9   :  { %s1882_s27 = scalar_lea.vmem %s31_s19, 8192  ;;  %p1887_p4 = scmp.lt.s32.totalorder %s31_s19, %s31_s19 }
   0xa   :  { %p1883_p3 = scmp.ne.s32.totalorder %s31_s19, %s1882_s27  ;;  %p1888_p5 = scmp.lt.s32.totalorder %s1882_s27, %s1882_s27 }
   0xc   :  { %p1889_p6 = por %p1888_p5, %p1887_p4 }
   0xe   :  { %p1890_p7 = pnand %p1889_p6, %p1883_p3 }
  0x10   :  { %1893 = shalt.err (!%p1890_p7)
}
  0x11   :  { %s1967_s28 = smov 64   ;;  %s1968_s29 = smov 4  }
  0x12   :  { %36 = dma.hbm_to_vmem [thread:$0]  %s2099_s1, 8192, %s31_s19, [#allocation6], %s1967_s28, %s1967_s28, %s1968_s29  }
  0x13   :  { %s1969_s7 = smov [#allocation2]   ;;  %s1894_s11 = scalar_lea.hbm %s2098_s0, 2048 }
  0x14   :  { %s18_s8 = sshll.u32 %s1969_s7, 4  ;;  %p1895_p8 = scmp.ne.s32.totalorder %s2098_s0, %s1894_s11  ;;  %s19_s8 = int_to_ptr.vmem [resolvable:$true] %s18_s8 }
  0x15   :  { %p1898_p9 = scmp.lt.u32.totalorder %s1894_s11, %s2098_s0 }
  0x17   :  { %p1900_p10 = pnand %p1898_p9, %p1895_p8 }
  0x19   :  { %1903 = shalt.err (!%p1900_p10)
}
  0x1a   :  { %s1904_s16 = scalar_lea.vmem %s19_s8, 2048  ;;  %p1909_p12 = scmp.lt.s32.totalorder %s19_s8, %s19_s8 }
  0x1b   :  { %p1905_p11 = scmp.ne.s32.totalorder %s19_s8, %s1904_s16  ;;  %p1910_p13 = scmp.lt.s32.totalorder %s1904_s16, %s1904_s16 }
  0x1d   :  { %p1911_p0 = por %p1910_p13, %p1909_p12 }
  0x1f   :  { %p1912_p1 = pnand %p1911_p0, %p1905_p11 }
  0x21   :  { %1915 = shalt.err (!%p1912_p1)
}
  0x22   :  { %s1970_s1 = smov 1024   ;;  %s1971_s19 = smov [#allocation7]  }
  0x23   :  { %24 = dma.hbm_to_vmem [thread:$0]  %s2098_s0, 2048, %s19_s8, [#allocation3], %s1970_s1, %s1970_s1, %s1967_s28  }
  0x24   :  { %s44_s20 = sshll.u32 %s1971_s19, 4  ;;  %s1916_s23 = scalar_lea.hbm %s2101_s3, 8192  ;;  %s45_s20 = int_to_ptr.vmem [resolvable:$true] %s44_s20 }
  0x25   :  { %p1917_p2 = scmp.ne.s32.totalorder %s2101_s3, %s1916_s23  ;;  %p1920_p3 = scmp.lt.u32.totalorder %s1916_s23, %s2101_s3 }
  0x27   :  { %p1922_p4 = pnand %p1920_p3, %p1917_p2 }
  0x29   :  { %1925 = shalt.err (!%p1922_p4)
}
  0x2a   :  { %s1926_s29 = scalar_lea.vmem %s45_s20, 8192  ;;  %p1931_p6 = scmp.lt.s32.totalorder %s45_s20, %s45_s20 }
  0x2b   :  { %p1927_p5 = scmp.ne.s32.totalorder %s45_s20, %s1926_s29  ;;  %p1932_p7 = scmp.lt.s32.totalorder %s1926_s29, %s1926_s29 }
  0x2d   :  { %p1933_p8 = por %p1932_p7, %p1931_p6 }
  0x2f   :  { %p1934_p9 = pnand %p1933_p8, %p1927_p5 }
  0x31   :  { %1937 = shalt.err (!%p1934_p9)
}
  0x32   :  { %s1972_s0 = smov 512   ;;  %s1973_s30 = smov 32  }
  0x33   :  { %50 = dma.hbm_to_vmem [thread:$0]  %s2101_s3, 8192, %s45_s20, [#allocation6], %s1972_s0, %s1972_s0, %s1973_s30  }
  0x34   :  { %1960 = dma.done.wait [#allocation3], 2048  }
  0x35   :  { %1961 = vsyncadd [#allocation3], 4294965248 }
  0x36   :  { %1962 = dma.done.wait [#allocation6], 16384  }
  0x37   :  { %1963 = vsyncadd [#allocation6], 4294950912  ;;  %v1744_v0 = vld [vmem:[#allocation5 + $0x40] sm:$0xff]   ;;  %v1748_v4 = vld [vmem:[#allocation5 + $0x48] sm:$0xff]  }
  0x38   :  { %v1745_v1 = vld [vmem:[#allocation5 + $0xc0] sm:$0xff]   ;;  %1646 = vmatprep.subr.bf16.mxu0 %v1744_v0  ;;  %v1749_v5 = vld [vmem:[#allocation5 + $0xc8] sm:$0xff]   ;;  %v1752_v8 = vld [vmem:[#allocation5 + $0x50] sm:$0xff]  }
  0x39   :  { %v1746_v2 = vld [vmem:[#allocation5] sm:$0xff]   ;;  %1668 = vmatprep.subr.bf16.mxu1 %v1745_v1  ;;  %v1750_v6 = vld [vmem:[#allocation5 + $0x8] sm:$0xff]   ;;  %v1753_v9 = vld [vmem:[#allocation5 + $0xd0] sm:$0xff]  }
  0x3a   :  { %v1747_v3 = vld [vmem:[#allocation5 + $0x80] sm:$0xff]   ;;  %1647 = vmatpush3.bf16.msra.mxu0 %v1746_v2  ;;  %v1751_v7 = vld [vmem:[#allocation5 + $0x88] sm:$0xff]   ;;  %v1754_v10 = vld [vmem:[#allocation5 + $0x10] sm:$0xff]  }
  0x3b   :  { %1669 = vmatpush3.bf16.msra.mxu1 %v1747_v3  ;;  %1648 = vmatprep.subr.bf16.mxu0 %v1748_v4  ;;  %v1755_v11 = vld [vmem:[#allocation5 + $0x90] sm:$0xff]   ;;  %v1756_v12 = vld [vmem:[#allocation5 + $0x58] sm:$0xff]   ;;  %v1760_v16 = vld [vmem:[#allocation5 + $0x60] sm:$0xff]  }
  0x3c   :  { %1670 = vmatprep.subr.bf16.mxu1 %v1749_v5  ;;  %v1757_v13 = vld [vmem:[#allocation5 + $0xd8] sm:$0xff]   ;;  %v1761_v17 = vld [vmem:[#allocation5 + $0xe0] sm:$0xff]   ;;  %v1764_v20 = vld [vmem:[#allocation5 + $0x68] sm:$0xff]  }
  0x3d   :  { %v1758_v14 = vld [vmem:[#allocation5 + $0x18] sm:$0xff]   ;;  %v1762_v18 = vld [vmem:[#allocation5 + $0x20] sm:$0xff]   ;;  %v1765_v21 = vld [vmem:[#allocation5 + $0xe8] sm:$0xff]  }
  0x3e   :  { %1649 = vmatpush3.bf16.msra.mxu0 %v1750_v6  ;;  %v1759_v15 = vld [vmem:[#allocation5 + $0x98] sm:$0xff]   ;;  %v1763_v19 = vld [vmem:[#allocation5 + $0xa0] sm:$0xff]   ;;  %v1766_v22 = vld [vmem:[#allocation5 + $0x28] sm:$0xff]  }
  0x3f   :  { %1671 = vmatpush3.bf16.msra.mxu1 %v1751_v7  ;;  %1650 = vmatprep.subr.bf16.mxu0 %v1752_v8  ;;  %v1767_v23 = vld [vmem:[#allocation5 + $0xa8] sm:$0xff]   ;;  %v1768_v24 = vld [vmem:[#allocation5 + $0x70] sm:$0xff]   ;;  %v1772_v28 = vld [vmem:[#allocation5 + $0x78] sm:$0xff]  }
  0x40   :  { %1672 = vmatprep.subr.bf16.mxu1 %v1753_v9  ;;  %v1769_v25 = vld [vmem:[#allocation5 + $0xf0] sm:$0xff]   ;;  %v1773_v29 = vld [vmem:[#allocation5 + $0xf8] sm:$0xff]   ;;  %v64_v32 = vld [vmem:[#allocation2 + $0x8] sm:$0xff] }
  0x41   :  { %v1770_v26 = vld [vmem:[#allocation5 + $0x30] sm:$0xff]   ;;  %v1774_v30 = vld [vmem:[#allocation5 + $0x38] sm:$0xff]   ;;  %v72_v33 = vld [vmem:[#allocation2 + $0x48] sm:$0xff] }
  0x42   :  { %1651 = vmatpush3.bf16.msra.mxu0 %v1754_v10  ;;  %v1771_v27 = vld [vmem:[#allocation5 + $0xb0] sm:$0xff]   ;;  %v1775_v31 = vld [vmem:[#allocation5 + $0xb8] sm:$0xff]   ;;  %v80_v35 = vpack.c.bf16 %v72_v33, %v64_v32  ;;  %v63_v37 = vld [vmem:[#allocation2] sm:$0xff] }
  0x43   :  { %1673 = vmatpush3.bf16.msra.mxu1 %v1755_v11  ;;  %1652 = vmatprep.subr.bf16.mxu0 %v1756_v12  ;;  %v66_v34 = vld [vmem:[#allocation2 + $0x18] sm:$0xff]  ;;  %v71_v38 = vld [vmem:[#allocation2 + $0x40] sm:$0xff]  ;;  %v65_v41 = vld [vmem:[#allocation2 + $0x10] sm:$0xff] }
  0x44   :  { %1674 = vmatprep.subr.bf16.mxu1 %v1757_v13  ;;  %v74_v36 = vld [vmem:[#allocation2 + $0x58] sm:$0xff]  ;;  %v79_v40 = vpack.c.bf16 %v71_v38, %v63_v37  ;;  %v73_v42 = vld [vmem:[#allocation2 + $0x50] sm:$0xff]  ;;  %638 = vmatprep.mubr.bf16.mxu0 %v80_v35  ;;  %v1776_v44 = vld [vmem:[#allocation5 + $0x140] sm:$0xff]  }
  0x45   :  { %v82_v39 = vpack.c.bf16 %v74_v36, %v66_v34  ;;  %v81_v43 = vpack.c.bf16 %v73_v42, %v65_v41  ;;  %v1777_v45 = vld [vmem:[#allocation5 + $0x1c0] sm:$0xff]   ;;  %v1780_v48 = vld [vmem:[#allocation5 + $0x148] sm:$0xff]   ;;  %v1784_v52 = vld [vmem:[#allocation5 + $0x150] sm:$0xff]  }
  0x46   :  { %1653 = vmatpush3.bf16.msra.mxu0 %v1758_v14  ;;  %v1778_v46 = vld [vmem:[#allocation5 + $0x100] sm:$0xff]   ;;  %v1781_v49 = vld [vmem:[#allocation5 + $0x1c8] sm:$0xff]   ;;  %v1785_v53 = vld [vmem:[#allocation5 + $0x1d0] sm:$0xff]  }
  0x47   :  { %1675 = vmatpush3.bf16.msra.mxu1 %v1759_v15  ;;  %1654 = vmatprep.subr.bf16.mxu0 %v1760_v16  ;;  %v1779_v47 = vld [vmem:[#allocation5 + $0x180] sm:$0xff]   ;;  %v1782_v50 = vld [vmem:[#allocation5 + $0x108] sm:$0xff]   ;;  %v1786_v54 = vld [vmem:[#allocation5 + $0x110] sm:$0xff]  }
  0x48   :  { %1676 = vmatprep.subr.bf16.mxu1 %v1761_v17  ;;  %679 = vmatprep.mubr.bf16.mxu1 %v82_v39  ;;  %v1783_v51 = vld [vmem:[#allocation5 + $0x188] sm:$0xff]   ;;  %v1787_v55 = vld [vmem:[#allocation5 + $0x190] sm:$0xff]   ;;  %v1788_v56 = vld [vmem:[#allocation5 + $0x158] sm:$0xff]  }
  0x49   :  { %v1789_v57 = vld [vmem:[#allocation5 + $0x1d8] sm:$0xff]   ;;  %v1792_v60 = vld [vmem:[#allocation5 + $0x160] sm:$0xff]   ;;  %v1796_v0 = vld [vmem:[#allocation5 + $0x168] sm:$0xff]  }
  0x4a   :  { %1655 = vmatpush3.bf16.msra.mxu0 %v1762_v18  ;;  %v1790_v58 = vld [vmem:[#allocation5 + $0x118] sm:$0xff]   ;;  %v1793_v61 = vld [vmem:[#allocation5 + $0x1e0] sm:$0xff]   ;;  %v1797_v1 = vld [vmem:[#allocation5 + $0x1e8] sm:$0xff]  }
  0x4b   :  { %1677 = vmatpush3.bf16.msra.mxu1 %v1763_v19  ;;  %1656 = vmatprep.subr.bf16.mxu0 %v1764_v20  ;;  %v1791_v59 = vld [vmem:[#allocation5 + $0x198] sm:$0xff]   ;;  %v1794_v62 = vld [vmem:[#allocation5 + $0x120] sm:$0xff]   ;;  %v1798_v2 = vld [vmem:[#allocation5 + $0x128] sm:$0xff]  }
  0x4c   :  { %1678 = vmatprep.subr.bf16.mxu1 %v1765_v21  ;;  %v1795_v63 = vld [vmem:[#allocation5 + $0x1a0] sm:$0xff]   ;;  %v1799_v3 = vld [vmem:[#allocation5 + $0x1a8] sm:$0xff]   ;;  %v1800_v4 = vld [vmem:[#allocation5 + $0x170] sm:$0xff]  }
  0x4d   :  { %v1801_v5 = vld [vmem:[#allocation5 + $0x1f0] sm:$0xff]   ;;  %v1804_v8 = vld [vmem:[#allocation5 + $0x178] sm:$0xff]   ;;  %v68_v12 = vld [vmem:[#allocation2 + $0x28] sm:$0xff] }
  0x4e   :  { %1657 = vmatpush3.bf16.msra.mxu0 %v1766_v22  ;;  %v1802_v6 = vld [vmem:[#allocation5 + $0x130] sm:$0xff]   ;;  %v1805_v9 = vld [vmem:[#allocation5 + $0x1f8] sm:$0xff]   ;;  %v76_v13 = vld [vmem:[#allocation2 + $0x68] sm:$0xff] }
  0x4f   :  { %1679 = vmatpush3.bf16.msra.mxu1 %v1767_v23  ;;  %1658 = vmatprep.subr.bf16.mxu0 %v1768_v24  ;;  %v1803_v7 = vld [vmem:[#allocation5 + $0x1b0] sm:$0xff]   ;;  %v1806_v10 = vld [vmem:[#allocation5 + $0x138] sm:$0xff]   ;;  %v84_v16 = vpack.c.bf16 %v76_v13, %v68_v12  ;;  %v67_v18 = vld [vmem:[#allocation2 + $0x20] sm:$0xff] }
  0x50   :  { %1680 = vmatprep.subr.bf16.mxu1 %v1769_v25  ;;  %v1807_v11 = vld [vmem:[#allocation5 + $0x1b8] sm:$0xff]   ;;  %v75_v19 = vld [vmem:[#allocation2 + $0x60] sm:$0xff]  ;;  %v69_v20 = vld [vmem:[#allocation2 + $0x30] sm:$0xff] }
  0x51   :  { %v70_v14 = vld [vmem:[#allocation2 + $0x38] sm:$0xff]  ;;  %v83_v21 = vpack.c.bf16 %v75_v19, %v67_v18  ;;  %v77_v22 = vld [vmem:[#allocation2 + $0x70] sm:$0xff]  ;;  %v773_v24 = vld [vmem:[#allocation7] sm:$0xff] }
  0x52   :  { %1659 = vmatpush3.bf16.msra.mxu0 %v1770_v26  ;;  %v78_v15 = vld [vmem:[#allocation2 + $0x78] sm:$0xff]  ;;  %v85_v23 = vpack.c.bf16 %v77_v22, %v69_v20  ;;  %v777_v25 = vld [vmem:[#allocation7 + $0x20] sm:$0xff]  ;;  %v774_v26 = vld [vmem:[#allocation7 + $0x8] sm:$0xff] }
  0x53   :  { %1681 = vmatpush3.bf16.msra.mxu1 %v1771_v27  ;;  %1660 = vmatprep.subr.bf16.mxu0 %v1772_v28  ;;  %v86_v17 = vpack.c.bf16 %v78_v15, %v70_v14  ;;  %v1566_v27 = vcombine.low %v773_v24, %v777_v25  ;;  %v1567_v28 = vcombine.high %v773_v24, %v777_v25  ;;  %v782_v35 = vld [vmem:[#allocation7 + $0x48] sm:$0xff]  ;;  %v789_v37 = vld [vmem:[#allocation7 + $0x80] sm:$0xff]  ;;  %v775_v24 = vld [vmem:[#allocation7 + $0x10] sm:$0xff] }
  0x54   :  { %1682 = vmatprep.subr.bf16.mxu1 %v1773_v29  ;;  %v778_v29 = vld [vmem:[#allocation7 + $0x28] sm:$0xff]  ;;  %v793_v39 = vld [vmem:[#allocation7 + $0xa0] sm:$0xff]  ;;  %v779_v25 = vld [vmem:[#allocation7 + $0x30] sm:$0xff] }
  0x55   :  { %v1568_v32 = vcombine.low %v774_v26, %v778_v29  ;;  %v1569_v33 = vcombine.high %v774_v26, %v778_v29  ;;  %v786_v36 = vld [vmem:[#allocation7 + $0x68] sm:$0xff]  ;;  %v776_v26 = vld [vmem:[#allocation7 + $0x18] sm:$0xff] }
  0x56   :  { %1661 = vmatpush3.bf16.msra.mxu0 %v1774_v30  ;;  %v781_v30 = vld [vmem:[#allocation7 + $0x40] sm:$0xff]  ;;  %v1577_v38 = vcombine.high %v782_v35, %v786_v36  ;;  %v794_v41 = vld [vmem:[#allocation7 + $0xa8] sm:$0xff]  ;;  %v780_v29 = vld [vmem:[#allocation7 + $0x38] sm:$0xff] }
  0x57   :  { %1683 = vmatpush3.bf16.msra.mxu1 %v1775_v31  ;;  %1690 = vmatprep.subr.bf16.mxu0 %v1776_v44  ;;  %v785_v31 = vld [vmem:[#allocation7 + $0x60] sm:$0xff]  ;;  %v1583_v44 = vcombine.high %v789_v37, %v793_v39  ;;  %v826_v12 = vld [vmem:[#allocation7 + $0x1a8] sm:$0xff] }
  0x58   :  { %1712 = vmatprep.subr.bf16.mxu1 %v1777_v45  ;;  %v1575_v34 = vcombine.high %v781_v30, %v785_v31  ;;  %v1574_v42 = vcombine.low %v781_v30, %v785_v31  ;;  %v830_v18 = vld [vmem:[#allocation7 + $0x1c8] sm:$0xff]  ;;  %v1974_v30 = vmov 0   ;;  %v1572_v31 = vcombine.low %v776_v26, %v780_v29 }
  0x59   :  { %639 = vmatmul.mubr.bf16.vlgmr.msra.gmra.mrb[0].mxu0 %v79_v40  ;;  %v790_v40 = vld [vmem:[#allocation7 + $0x88] sm:$0xff] }
  0x5a   :  { %680 = vmatmul.mubr.bf16.vlgmr.msra.gmra.mrb[0].mxu1 %v81_v43  ;;  %1691 = vmatpush3.bf16.msra.mxu0 %v1778_v46  ;;  %v1576_v43 = vcombine.low %v782_v35, %v786_v36  ;;  %v1585_v45 = vcombine.high %v790_v40, %v794_v41  ;;  %v797_v46 = vld [vmem:[#allocation7 + $0xc0] sm:$0xff]  ;;  %v834_v20 = vld [vmem:[#allocation7 + $0x1e8] sm:$0xff] }
  0x5b   :  { %1713 = vmatpush3.bf16.msra.mxu1 %v1779_v47  ;;  %1692 = vmatprep.subr.bf16.mxu0 %v1780_v48  ;;  %v801_v47 = vld [vmem:[#allocation7 + $0xe0] sm:$0xff]  ;;  %v798_v48 = vld [vmem:[#allocation7 + $0xc8] sm:$0xff]  ;;  %v1624_v22 = vcombine.low %v830_v18, %v834_v20 }
  0x5c   :  { %1714 = vmatprep.subr.bf16.mxu1 %v1781_v49  ;;  %720 = vmatprep.mubr.bf16.mxu0 %v84_v16  ;;  %v802_v49 = vld [vmem:[#allocation7 + $0xe8] sm:$0xff]  ;;  %v829_v16 = vld [vmem:[#allocation7 + $0x1c0] sm:$0xff] }
  0x5d   :  { %761 = vmatprep.mubr.bf16.mxu1 %v86_v17  ;;  %v833_v17 = vld [vmem:[#allocation7 + $0x1e0] sm:$0xff] }
  0x5e   :  { %1693 = vmatpush3.bf16.msra.mxu0 %v1782_v50  ;;  %v1582_v50 = vcombine.low %v789_v37, %v793_v39  ;;  %v1623_v19 = vcombine.high %v829_v16, %v833_v17  ;;  %v1501_v35 = vld [vmem:[%s2100_s2] ss:$0 sm:$0xff] }
  0x5f   :  { %1715 = vmatpush3.bf16.msra.mxu1 %v1783_v51  ;;  %1694 = vmatprep.subr.bf16.mxu0 %v1784_v52  ;;  %v1584_v51 = vcombine.low %v790_v40, %v794_v41  ;;  %v1591_v52 = vcombine.high %v797_v46, %v801_v47 }
  0x60   :  { %1716 = vmatprep.subr.bf16.mxu1 %v1785_v53  ;;  %v1593_v53 = vcombine.high %v798_v48, %v802_v49 }
  0x62   :  { %1695 = vmatpush3.bf16.msra.mxu0 %v1786_v54  ;;  %v805_v54 = vld [vmem:[#allocation7 + $0x100] sm:$0xff] }
  0x63   :  { %1717 = vmatpush3.bf16.msra.mxu1 %v1787_v55  ;;  %1696 = vmatprep.subr.bf16.mxu0 %v1788_v56  ;;  %v809_v55 = vld [vmem:[#allocation7 + $0x120] sm:$0xff]  ;;  %v806_v56 = vld [vmem:[#allocation7 + $0x108] sm:$0xff] }
  0x64   :  { %1718 = vmatprep.subr.bf16.mxu1 %v1789_v57  ;;  %v810_v57 = vld [vmem:[#allocation7 + $0x128] sm:$0xff] }
  0x66   :  { %1697 = vmatpush3.bf16.msra.mxu0 %v1790_v58  ;;  %v1590_v58 = vcombine.low %v797_v46, %v801_v47 }
  0x67   :  { %1719 = vmatpush3.bf16.msra.mxu1 %v1791_v59  ;;  %1698 = vmatprep.subr.bf16.mxu0 %v1792_v60  ;;  %v1592_v59 = vcombine.low %v798_v48, %v802_v49  ;;  %v1599_v60 = vcombine.high %v805_v54, %v809_v55 }
  0x68   :  { %1720 = vmatprep.subr.bf16.mxu1 %v1793_v61  ;;  %v1601_v61 = vcombine.high %v806_v56, %v810_v57 }
  0x6a   :  { %1699 = vmatpush3.bf16.msra.mxu0 %v1794_v62  ;;  %v1598_v62 = vcombine.low %v805_v54, %v809_v55 }
  0x6b   :  { %1721 = vmatpush3.bf16.msra.mxu1 %v1795_v63  ;;  %1700 = vmatprep.subr.bf16.mxu0 %v1796_v0  ;;  %v1600_v63 = vcombine.low %v806_v56, %v810_v57  ;;  %v813_v0 = vld [vmem:[#allocation7 + $0x140] sm:$0xff] }
  0x6c   :  { %1722 = vmatprep.subr.bf16.mxu1 %v1797_v1  ;;  %v817_v1 = vld [vmem:[#allocation7 + $0x160] sm:$0xff] }
  0x6e   :  { %1701 = vmatpush3.bf16.msra.mxu0 %v1798_v2  ;;  %v814_v2 = vld [vmem:[#allocation7 + $0x148] sm:$0xff] }
  0x6f   :  { %1723 = vmatpush3.bf16.msra.mxu1 %v1799_v3  ;;  %1702 = vmatprep.subr.bf16.mxu0 %v1800_v4  ;;  %v1607_v3 = vcombine.high %v813_v0, %v817_v1  ;;  %v818_v4 = vld [vmem:[#allocation7 + $0x168] sm:$0xff] }
  0x70   :  { %1724 = vmatprep.subr.bf16.mxu1 %v1801_v5  ;;  %v1606_v5 = vcombine.low %v813_v0, %v817_v1 }
  0x72   :  { %1703 = vmatpush3.bf16.msra.mxu0 %v1802_v6  ;;  %v1608_v6 = vcombine.low %v814_v2, %v818_v4 }
  0x73   :  { %1725 = vmatpush3.bf16.msra.mxu1 %v1803_v7  ;;  %1704 = vmatprep.subr.bf16.mxu0 %v1804_v8  ;;  %v1609_v7 = vcombine.high %v814_v2, %v818_v4  ;;  %v821_v8 = vld [vmem:[#allocation7 + $0x180] sm:$0xff]  ;;  %v783_v2 = vld [vmem:[#allocation7 + $0x50] sm:$0xff]  ;;  %v784_v4 = vld [vmem:[#allocation7 + $0x58] sm:$0xff] }
  0x74   :  { %1726 = vmatprep.subr.bf16.mxu1 %v1805_v9  ;;  %v825_v9 = vld [vmem:[#allocation7 + $0x1a0] sm:$0xff] }
  0x75   :  { %v1614_v13 = vcombine.low %v821_v8, %v825_v9 }
  0x76   :  { %1705 = vmatpush3.bf16.msra.mxu0 %v1806_v10  ;;  %v822_v10 = vld [vmem:[#allocation7 + $0x188] sm:$0xff] }
  0x77   :  { %1727 = vmatpush3.bf16.msra.mxu1 %v1807_v11  ;;  %1199 = vmatprep.subr.bf16.mxu0 %v1567_v28  ;;  %v1615_v11 = vcombine.high %v821_v8, %v825_v9  ;;  %v1616_v14 = vcombine.low %v822_v10, %v826_v12  ;;  %v1617_v15 = vcombine.high %v822_v10, %v826_v12  ;;  %v795_v12 = vld [vmem:[#allocation7 + $0xb0] sm:$0xff] }
  0x78   :  { %1242 = vmatprep.subr.bf16.mxu1 %v1569_v33  ;;  %v1571_v28 = vcombine.high %v775_v24, %v779_v25 }
  0x79   :  { %721 = vmatmul.mubr.bf16.vlgmr.msra.gmra.mrb[4].mxu0 %v83_v21  ;;  %v1622_v21 = vcombine.low %v829_v16, %v833_v17 }
  0x7a   :  { %762 = vmatmul.mubr.bf16.vlgmr.msra.gmra.mrb[4].mxu1 %v85_v23  ;;  %1200 = vmatpush1.bf16.msra.mxu0 %v1566_v27  ;;  %v1625_v23 = vcombine.high %v830_v18, %v834_v20  ;;  %v1570_v27 = vcombine.low %v775_v24, %v779_v25  ;;  %v803_v20 = vld [vmem:[#allocation7 + $0xf0] sm:$0xff] }
  0x7b   :  { %1243 = vmatpush1.bf16.msra.mxu1 %v1568_v32  ;;  %1201 = vmatprep.subr.bf16.mxu0 %v1575_v34  ;;  %v1573_v32 = vcombine.high %v776_v26, %v780_v29  ;;  %v808_v29 = vld [vmem:[#allocation7 + $0x118] sm:$0xff] }
  0x7c   :  { %1244 = vmatprep.subr.bf16.mxu1 %v1577_v38  ;;  %1231 = vmatprep.mubr.bf16.mxu0 %v1974_v30 }
  0x7d   :  { %1274 = vmatprep.mubr.bf16.mxu1 %v1974_v30 }
  0x7e   :  { %1202 = vmatpush1.bf16.msra.mxu0 %v1574_v42 }
  0x7f   :  { %1245 = vmatpush1.bf16.msra.mxu1 %v1576_v43  ;;  %1203 = vmatprep.subr.bf16.mxu0 %v1583_v44 }
  0x80   :  { %1246 = vmatprep.subr.bf16.mxu1 %v1585_v45 }
  0x82   :  { %1204 = vmatpush1.bf16.msra.mxu0 %v1582_v50 }
  0x83   :  { %1247 = vmatpush1.bf16.msra.mxu1 %v1584_v51  ;;  %1205 = vmatprep.subr.bf16.mxu0 %v1591_v52 }
  0x84   :  { %1248 = vmatprep.subr.bf16.mxu1 %v1593_v53 }
  0x86   :  { %1206 = vmatpush1.bf16.msra.mxu0 %v1590_v58 }
  0x87   :  { %1249 = vmatpush1.bf16.msra.mxu1 %v1592_v59  ;;  %1207 = vmatprep.subr.bf16.mxu0 %v1599_v60 }
  0x88   :  { %1250 = vmatprep.subr.bf16.mxu1 %v1601_v61 }
  0x8a   :  { %1208 = vmatpush1.bf16.msra.mxu0 %v1598_v62 }
  0x8b   :  { %1251 = vmatpush1.bf16.msra.mxu1 %v1600_v63  ;;  %1209 = vmatprep.subr.bf16.mxu0 %v1607_v3  ;;  %v787_v3 = vld [vmem:[#allocation7 + $0x70] sm:$0xff] }
  0x8c   :  { %1252 = vmatprep.subr.bf16.mxu1 %v1609_v7  ;;  %v1579_v9 = vcombine.high %v783_v2, %v787_v3 }
  0x8e   :  { %1210 = vmatpush1.bf16.msra.mxu0 %v1606_v5  ;;  %v788_v5 = vld [vmem:[#allocation7 + $0x78] sm:$0xff] }
  0x8f   :  { %1253 = vmatpush1.bf16.msra.mxu1 %v1608_v6  ;;  %1211 = vmatprep.subr.bf16.mxu0 %v1615_v11  ;;  %v1581_v10 = vcombine.high %v784_v4, %v788_v5  ;;  %v791_v11 = vld [vmem:[#allocation7 + $0x90] sm:$0xff]  ;;  %v1580_v16 = vcombine.low %v784_v4, %v788_v5 }
  0x90   :  { %1254 = vmatprep.subr.bf16.mxu1 %v1617_v15  ;;  %v1578_v15 = vcombine.low %v783_v2, %v787_v3  ;;  %v1587_v17 = vcombine.high %v791_v11, %v795_v12 }
  0x92   :  { %1212 = vmatpush1.bf16.msra.mxu0 %v1614_v13  ;;  %v792_v13 = vld [vmem:[#allocation7 + $0x98] sm:$0xff] }
  0x93   :  { %1255 = vmatpush1.bf16.msra.mxu1 %v1616_v14  ;;  %1213 = vmatprep.subr.bf16.mxu0 %v1623_v19  ;;  %v796_v14 = vld [vmem:[#allocation7 + $0xb8] sm:$0xff]  ;;  %v799_v19 = vld [vmem:[#allocation7 + $0xd0] sm:$0xff] }
  0x94   :  { %1256 = vmatprep.subr.bf16.mxu1 %v1625_v23  ;;  %v1589_v18 = vcombine.high %v792_v13, %v796_v14  ;;  %v1586_v23 = vcombine.low %v791_v11, %v795_v12  ;;  %v1588_v24 = vcombine.low %v792_v13, %v796_v14  ;;  %v1595_v25 = vcombine.high %v799_v19, %v803_v20 }
  0x96   :  { %1214 = vmatpush1.bf16.msra.mxu0 %v1622_v21  ;;  %v800_v21 = vld [vmem:[#allocation7 + $0xd8] sm:$0xff] }
  0x97   :  { %1257 = vmatpush1.bf16.msra.mxu1 %v1624_v22  ;;  %1285 = vmatprep.subr.bf16.mxu0 %v1571_v28  ;;  %v804_v22 = vld [vmem:[#allocation7 + $0xf8] sm:$0xff]  ;;  %v811_v28 = vld [vmem:[#allocation7 + $0x130] sm:$0xff] }
  0x98   :  { %1328 = vmatprep.subr.bf16.mxu1 %v1573_v32  ;;  %v1597_v26 = vcombine.high %v800_v21, %v804_v22  ;;  %v1594_v32 = vcombine.low %v799_v19, %v803_v20 }
 0x12c   :  { %v1662_v33 = vpop.f32.mrb[0].mxu0 }
 0x12d   :  { %v1684_v34 = vpop.f32.mrb[0].mxu1  ;;  %v1663_v36 = vpop.f32.mrb[1].mxu0 }
 0x12e   :  { %v1664_v37 = vadd.f32 %v1663_v36, %v1662_v33  ;;  %v1685_v38 = vpop.f32.mrb[1].mxu1  ;;  %v1665_v39 = vpop.f32.mrb[2].mxu0  ;;  %v1596_v33 = vcombine.low %v800_v21, %v804_v22  ;;  %v819_v36 = vld [vmem:[#allocation7 + $0x170] sm:$0xff] }
 0x12f   :  { %v1686_v40 = vadd.f32 %v1685_v38, %v1684_v34  ;;  %v1687_v41 = vpop.f32.mrb[2].mxu1  ;;  %v1666_v42 = vpop.f32.mrb[3].mxu0  ;;  %v820_v38 = vld [vmem:[#allocation7 + $0x178] sm:$0xff] }
 0x130   :  { %v641_v43 = vadd.f32 %v1664_v37, %v1501_v35  ;;  %v1667_v44 = vadd.f32 %v1666_v42, %v1665_v39  ;;  %v1688_v45 = vpop.f32.mrb[3].mxu1  ;;  %v816_v37 = vld [vmem:[#allocation7 + $0x158] sm:$0xff] }
 0x131   :  { %v1689_v46 = vadd.f32 %v1688_v45, %v1687_v41  ;;  %v1613_v42 = vcombine.high %v816_v37, %v820_v38  ;;  %v824_v45 = vld [vmem:[#allocation7 + $0x198] sm:$0xff] }
 0x132   :  { %v682_v47 = vadd.f32 %v1686_v40, %v641_v43  ;;  %v644_v48 = vadd.f32 %v1667_v44, %v1501_v35  ;;  %v815_v35 = vld [vmem:[#allocation7 + $0x150] sm:$0xff] }
 0x133   :  { %v1611_v41 = vcombine.high %v815_v35, %v819_v36  ;;  %v823_v43 = vld [vmem:[#allocation7 + $0x190] sm:$0xff] }
 0x134   :  { %v685_v49 = vadd.f32 %v1689_v46, %v644_v48  ;;  %v827_v44 = vld [vmem:[#allocation7 + $0x1b0] sm:$0xff]  ;;  %v828_v46 = vld [vmem:[#allocation7 + $0x1b8] sm:$0xff]  ;;  %v1612_v48 = vcombine.low %v816_v37, %v820_v38 }
 0x14c   :  { %v1706_v50 = vpop.f32.mrb[4].mxu0 }
 0x14d   :  { %v1728_v51 = vpop.f32.mrb[4].mxu1  ;;  %v1707_v52 = vpop.f32.mrb[5].mxu0 }
 0x14e   :  { %v1708_v53 = vadd.f32 %v1707_v52, %v1706_v50  ;;  %v1729_v54 = vpop.f32.mrb[5].mxu1  ;;  %v1709_v55 = vpop.f32.mrb[6].mxu0  ;;  %v1621_v50 = vcombine.high %v824_v45, %v828_v46  ;;  %v835_v52 = vld [vmem:[#allocation7 + $0x1f0] sm:$0xff] }
 0x14f   :  { %v1730_v56 = vadd.f32 %v1729_v54, %v1728_v51  ;;  %v1731_v57 = vpop.f32.mrb[6].mxu1  ;;  %v1710_v58 = vpop.f32.mrb[7].mxu0  ;;  %v831_v51 = vld [vmem:[#allocation7 + $0x1d0] sm:$0xff]  ;;  %v836_v54 = vld [vmem:[#allocation7 + $0x1f8] sm:$0xff] }
 0x150   :  { %v723_v59 = vadd.f32 %v1708_v53, %v682_v47  ;;  %v1711_v60 = vadd.f32 %v1710_v58, %v1709_v55  ;;  %v1732_v61 = vpop.f32.mrb[7].mxu1  ;;  %v1610_v47 = vcombine.low %v815_v35, %v819_v36  ;;  %v832_v53 = vld [vmem:[#allocation7 + $0x1d8] sm:$0xff]  ;;  %v1618_v55 = vcombine.low %v823_v43, %v827_v44 }
 0x151   :  { %v1733_v62 = vadd.f32 %v1732_v61, %v1731_v57  ;;  %v1627_v57 = vcombine.high %v831_v51, %v835_v52  ;;  %v1629_v58 = vcombine.high %v832_v53, %v836_v54  ;;  %v839_v61 = vlaneseq }
 0x152   :  { %v764_v63 = vadd.f32 %v1730_v56, %v723_v59  ;;  %v726_v0 = vadd.f32 %v1711_v60, %v685_v49  ;;  %v1619_v49 = vcombine.high %v823_v43, %v827_v44  ;;  %v1620_v56 = vcombine.low %v824_v45, %v828_v46 }
 0x153   :  { %v1626_v59 = vcombine.low %v831_v51, %v835_v52  ;;  %v1628_v60 = vcombine.low %v832_v53, %v836_v54 }
 0x154   :  { %v767_v1 = vadd.f32 %v1733_v62, %v726_v0  ;;  %v770_v6 = vmax.f32 %v764_v63, 0.0  ;;  %v2060_v62 = vshrl.u32 %v839_v61, 7 }
 0x156   :  { %v771_v7 = vmax.f32 %v767_v1, 0.0  ;;  %v841_v63 = vsub.s32 0, %v2060_v62  ;;  %v849_v0 = vsub.s32 2, %v2060_v62  ;;  %v2067_v1 = vld [vmem:[%s2102_s4] sm:$0xff]  ;;  %v845_v2 = vsub.s32 1, %v2060_v62  ;;  %s1975_s4 = smov [#allocation8]  }
 0x157   :  { %v853_v3 = vsub.s32 3, %v2060_v62  ;;  %v869_v51 = vsub.s32 7, %v2060_v62  ;;  %s1488_s10 = sshll.u32 %s1975_s4, 4  ;;  %s1489_s10 = int_to_ptr.vmem [resolvable:$true] %s1488_s10 }
 0x158   :  { %v2052_v8 = vpack.c.bf16 %v771_v7, %v770_v6  ;;  %v842_v4 = vrot.slane %v2067_v1, %v841_v63  ;;  %v850_v5 = vrot.slane %v2067_v1, %v849_v0  ;;  %v846_v6 = vrot.slane %v2067_v1, %v845_v2  ;;  %s1938_s11 = scalar_lea.vmem %s1489_s10, 2048  ;;  %p1943_p11 = scmp.lt.s32.totalorder %s1489_s10, %s1489_s10 }
 0x159   :  { %v854_v7 = vrot.slane %v2067_v1, %v853_v3  ;;  %p1939_p10 = scmp.ne.s32.totalorder %s1489_s10, %s1938_s11  ;;  %p1944_p12 = scmp.lt.s32.totalorder %s1938_s11, %s1938_s11 }
 0x15a   :  { %1232 = vmatmul.mubr.bf16.vlgmr.msra.gmra.mrb[8].mxu0 %v2052_v8  ;;  %1275 = vmatmul.mubr.bf16.vlgmr.msra.gmra.mrb[8].mxu1 %v2052_v8 }
 0x15b   :  { %1286 = vmatpush1.bf16.msra.mxu0 %v1570_v27  ;;  %1329 = vmatpush1.bf16.msra.mxu1 %v1572_v31  ;;  %v807_v27 = vld [vmem:[#allocation7 + $0x110] sm:$0xff]  ;;  %v812_v31 = vld [vmem:[#allocation7 + $0x138] sm:$0xff]  ;;  %p1945_p13 = por %p1944_p12, %p1943_p11 }
 0x15c   :  { %1287 = vmatprep.subr.bf16.mxu0 %v1579_v9  ;;  %1330 = vmatprep.subr.bf16.mxu1 %v1581_v10  ;;  %v1603_v34 = vcombine.high %v807_v27, %v811_v28  ;;  %v1602_v39 = vcombine.low %v807_v27, %v811_v28  ;;  %v1604_v40 = vcombine.low %v808_v29, %v812_v31 }
 0x15d   :  { %1317 = vmatprep.mubr.bf16.mxu0 %v1974_v30  ;;  %1360 = vmatprep.mubr.bf16.mxu1 %v1974_v30  ;;  %v1605_v30 = vcombine.high %v808_v29, %v812_v31  ;;  %p1946_p0 = pnand %p1945_p13, %p1939_p10 }
 0x15f   :  { %1288 = vmatpush1.bf16.msra.mxu0 %v1578_v15  ;;  %1331 = vmatpush1.bf16.msra.mxu1 %v1580_v16 }
 0x160   :  { %1289 = vmatprep.subr.bf16.mxu0 %v1587_v17  ;;  %1332 = vmatprep.subr.bf16.mxu1 %v1589_v18 }
 0x163   :  { %1290 = vmatpush1.bf16.msra.mxu0 %v1586_v23  ;;  %1333 = vmatpush1.bf16.msra.mxu1 %v1588_v24 }
 0x164   :  { %1291 = vmatprep.subr.bf16.mxu0 %v1595_v25  ;;  %1334 = vmatprep.subr.bf16.mxu1 %v1597_v26 }
 0x167   :  { %1292 = vmatpush1.bf16.msra.mxu0 %v1594_v32  ;;  %1335 = vmatpush1.bf16.msra.mxu1 %v1596_v33 }
 0x168   :  { %1293 = vmatprep.subr.bf16.mxu0 %v1603_v34  ;;  %1336 = vmatprep.subr.bf16.mxu1 %v1605_v30 }
 0x16b   :  { %1294 = vmatpush1.bf16.msra.mxu0 %v1602_v39  ;;  %1337 = vmatpush1.bf16.msra.mxu1 %v1604_v40 }
 0x16c   :  { %1295 = vmatprep.subr.bf16.mxu0 %v1611_v41  ;;  %1338 = vmatprep.subr.bf16.mxu1 %v1613_v42 }
 0x16f   :  { %1296 = vmatpush1.bf16.msra.mxu0 %v1610_v47  ;;  %1339 = vmatpush1.bf16.msra.mxu1 %v1612_v48  ;;  %v857_v48 = vsub.s32 4, %v2060_v62 }
 0x170   :  { %1297 = vmatprep.subr.bf16.mxu0 %v1619_v49  ;;  %1340 = vmatprep.subr.bf16.mxu1 %v1621_v50  ;;  %v865_v49 = vsub.s32 6, %v2060_v62  ;;  %v861_v50 = vsub.s32 5, %v2060_v62 }
 0x171   :  { %v858_v54 = vrot.slane %v2067_v1, %v857_v48 }
 0x173   :  { %1298 = vmatpush1.bf16.msra.mxu0 %v1618_v55  ;;  %1341 = vmatpush1.bf16.msra.mxu1 %v1620_v56  ;;  %v866_v55 = vrot.slane %v2067_v1, %v865_v49 }
 0x174   :  { %1299 = vmatprep.subr.bf16.mxu0 %v1627_v57  ;;  %1342 = vmatprep.subr.bf16.mxu1 %v1629_v58  ;;  %v862_v57 = vrot.slane %v2067_v1, %v861_v50  ;;  %v870_v58 = vrot.slane %v2067_v1, %v869_v51 }
 0x177   :  { %1300 = vmatpush1.bf16.msra.mxu0 %v1626_v59  ;;  %1343 = vmatpush1.bf16.msra.mxu1 %v1628_v60 }
 0x17a   :  { %1318 = vmatmul.mubr.bf16.vlgmr.msra.gmra.mrb[12].mxu0 %v2052_v8  ;;  %1361 = vmatmul.mubr.bf16.vlgmr.msra.gmra.mrb[12].mxu1 %v2052_v8 }
 0x22d   :  { %v1233_v8 = vpop.f32.mrb[8].mxu0  ;;  %v1276_v9 = vpop.f32.mrb[8].mxu1 }
 0x22e   :  { %v1234_v10 = vadd.f32 %v1233_v8, %v842_v4  ;;  %v1277_v11 = vadd.f32 %v1276_v9, %v850_v5  ;;  %v1235_v12 = vpop.f32.mrb[9].mxu0  ;;  %v1278_v13 = vpop.f32.mrb[9].mxu1 }
 0x22f   :  { %v1236_v14 = vadd.f32 %v1235_v12, %v846_v6  ;;  %v1279_v15 = vadd.f32 %v1278_v13, %v854_v7  ;;  %v1237_v16 = vpop.f32.mrb[10].mxu0  ;;  %v1280_v17 = vpop.f32.mrb[10].mxu1 }
 0x230   :  { %v1630_v18 = vmul.f32 -1.442695, %v1234_v10  ;;  %v1632_v19 = vmul.f32 -1.442695, %v1277_v11  ;;  %v1238_v20 = vadd.f32 %v1237_v16, %v842_v4  ;;  %v1281_v21 = vadd.f32 %v1280_v17, %v850_v5  ;;  %v1239_v22 = vpop.f32.mrb[11].mxu0  ;;  %v1282_v23 = vpop.f32.mrb[11].mxu1 }
 0x231   :  { %v1631_v24 = vmul.f32 -1.442695, %v1236_v14  ;;  %v1633_v25 = vmul.f32 -1.442695, %v1279_v15  ;;  %v1240_v26 = vadd.f32 %v1239_v22, %v846_v6  ;;  %v1283_v27 = vadd.f32 %v1282_v23, %v854_v7 }
 0x232   :  { %1808 = vpow2.f32 %v1630_v18  ;;  %v1638_v28 = vmul.f32 -1.442695, %v1238_v20  ;;  %v1640_v29 = vmul.f32 -1.442695, %v1281_v21 }
 0x233   :  { %1810 = vpow2.f32 %v1632_v19  ;;  %v1639_v31 = vmul.f32 -1.442695, %v1240_v26  ;;  %v1641_v32 = vmul.f32 -1.442695, %v1283_v27 }
 0x234   :  { %1812 = vpow2.f32 %v1631_v24 }
 0x235   :  { %1814 = vpow2.f32 %v1633_v25 }
 0x236   :  { %1816 = vpow2.f32 %v1638_v28 }
 0x237   :  { %1818 = vpow2.f32 %v1640_v29 }
 0x238   :  { %1820 = vpow2.f32 %v1639_v31 }
 0x239   :  { %1822 = vpow2.f32 %v1641_v32 }
 0x23c   :  { %v1809_v33 = vpop.eup %1808 }
 0x23d   :  { %v1811_v34 = vpop.eup %1810  ;;  %v1419_v30 = vadd.f32 1.0, %v1809_v33 }
 0x23e   :  { %v1813_v35 = vpop.eup %1812  ;;  %v1421_v36 = vadd.f32 1.0, %v1811_v34 }
 0x23f   :  { %v1815_v37 = vpop.eup %1814  ;;  %1824 = vrcp.f32 %v1419_v30  ;;  %v1420_v38 = vadd.f32 1.0, %v1813_v35 }
 0x240   :  { %v1817_v39 = vpop.eup %1816  ;;  %1826 = vrcp.f32 %v1421_v36  ;;  %v1422_v40 = vadd.f32 1.0, %v1815_v37 }
 0x241   :  { %v1819_v41 = vpop.eup %1818  ;;  %1828 = vrcp.f32 %v1420_v38  ;;  %v1427_v42 = vadd.f32 1.0, %v1817_v39 }
 0x242   :  { %v1821_v43 = vpop.eup %1820  ;;  %1830 = vrcp.f32 %v1422_v40  ;;  %v1429_v44 = vadd.f32 1.0, %v1819_v41 }
 0x243   :  { %v1823_v45 = vpop.eup %1822  ;;  %1832 = vrcp.f32 %v1427_v42  ;;  %v1428_v46 = vadd.f32 1.0, %v1821_v43 }
 0x244   :  { %1834 = vrcp.f32 %v1429_v44  ;;  %v1430_v47 = vadd.f32 1.0, %v1823_v45 }
 0x245   :  { %1836 = vrcp.f32 %v1428_v46 }
 0x246   :  { %1838 = vrcp.f32 %v1430_v47 }
 0x249   :  { %v1825_v52 = vpop.eup %1824 }
 0x24a   :  { %v1827_v53 = vpop.eup %1826  ;;  %1467 = vst [vmem:[#allocation8] sm:$0xff] %v1825_v52 }
 0x24b   :  { %v1829_v56 = vpop.eup %1828  ;;  %1469 = vst [vmem:[#allocation8 + $0x10] sm:$0xff] %v1827_v53 }
 0x24c   :  { %v1831_v59 = vpop.eup %1830  ;;  %1468 = vst [vmem:[#allocation8 + $0x8] sm:$0xff] %v1829_v56 }
 0x24d   :  { %v1833_v60 = vpop.eup %1832  ;;  %1470 = vst [vmem:[#allocation8 + $0x18] sm:$0xff] %v1831_v59  ;;  %v1319_v61 = vpop.f32.mrb[12].mxu0 }
 0x24e   :  { %v1362_v63 = vpop.f32.mrb[12].mxu1  ;;  %v1835_v62 = vpop.eup %1834  ;;  %1475 = vst [vmem:[#allocation8 + $0x40] sm:$0xff] %v1833_v60  ;;  %v1320_v0 = vadd.f32 %v1319_v61, %v858_v54 }
 0x24f   :  { %v1363_v2 = vadd.f32 %v1362_v63, %v866_v55  ;;  %v1321_v3 = vpop.f32.mrb[13].mxu0  ;;  %v1364_v4 = vpop.f32.mrb[13].mxu1  ;;  %1477 = vst [vmem:[#allocation8 + $0x50] sm:$0xff] %v1835_v62 }
 0x250   :  { %v1837_v5 = vpop.eup %1836  ;;  %v1322_v6 = vadd.f32 %v1321_v3, %v862_v57  ;;  %v1365_v7 = vadd.f32 %v1364_v4, %v870_v58  ;;  %v1323_v8 = vpop.f32.mrb[14].mxu0  ;;  %v1634_v1 = vmul.f32 -1.442695, %v1320_v0 }
 0x251   :  { %v1366_v9 = vpop.f32.mrb[14].mxu1  ;;  %v1839_v10 = vpop.eup %1838  ;;  %1476 = vst [vmem:[#allocation8 + $0x48] sm:$0xff] %v1837_v5  ;;  %v1636_v11 = vmul.f32 -1.442695, %v1363_v2  ;;  %v1324_v12 = vadd.f32 %v1323_v8, %v858_v54 }
 0x252   :  { %v1367_v13 = vadd.f32 %v1366_v9, %v866_v55  ;;  %v1325_v14 = vpop.f32.mrb[15].mxu0  ;;  %v1368_v15 = vpop.f32.mrb[15].mxu1  ;;  %1478 = vst [vmem:[#allocation8 + $0x58] sm:$0xff] %v1839_v10  ;;  %v1635_v16 = vmul.f32 -1.442695, %v1322_v6  ;;  %1840 = vpow2.f32 %v1634_v1 }
 0x253   :  { %v1637_v17 = vmul.f32 -1.442695, %v1365_v7  ;;  %v1326_v18 = vadd.f32 %v1325_v14, %v862_v57  ;;  %v1369_v19 = vadd.f32 %v1368_v15, %v870_v58  ;;  %v1642_v20 = vmul.f32 -1.442695, %v1324_v12 }
 0x254   :  { %1842 = vpow2.f32 %v1636_v11  ;;  %v1644_v21 = vmul.f32 -1.442695, %v1367_v13 }
 0x255   :  { %1844 = vpow2.f32 %v1635_v16  ;;  %v1643_v22 = vmul.f32 -1.442695, %v1326_v18  ;;  %v1645_v23 = vmul.f32 -1.442695, %v1369_v19 }
 0x256   :  { %1846 = vpow2.f32 %v1637_v17 }
 0x257   :  { %1848 = vpow2.f32 %v1642_v20 }
 0x258   :  { %1850 = vpow2.f32 %v1644_v21 }
 0x259   :  { %1852 = vpow2.f32 %v1643_v22 }
 0x25a   :  { %1854 = vpow2.f32 %v1645_v23 }
 0x25c   :  { %v1841_v24 = vpop.eup %1840 }
 0x25d   :  { %v1423_v26 = vadd.f32 1.0, %v1841_v24 }
 0x25e   :  { %v1843_v25 = vpop.eup %1842 }
 0x25f   :  { %v1845_v27 = vpop.eup %1844  ;;  %v1425_v28 = vadd.f32 1.0, %v1843_v25  ;;  %1856 = vrcp.f32 %v1423_v26 }
 0x260   :  { %v1847_v29 = vpop.eup %1846  ;;  %v1424_v31 = vadd.f32 1.0, %v1845_v27 }
 0x261   :  { %v1849_v32 = vpop.eup %1848  ;;  %1858 = vrcp.f32 %v1425_v28  ;;  %v1426_v33 = vadd.f32 1.0, %v1847_v29 }
 0x262   :  { %v1851_v34 = vpop.eup %1850  ;;  %1860 = vrcp.f32 %v1424_v31  ;;  %v1431_v30 = vadd.f32 1.0, %v1849_v32 }
 0x263   :  { %v1853_v35 = vpop.eup %1852  ;;  %1862 = vrcp.f32 %v1426_v33  ;;  %v1433_v36 = vadd.f32 1.0, %v1851_v34 }
 0x264   :  { %v1855_v37 = vpop.eup %1854  ;;  %1864 = vrcp.f32 %v1431_v30  ;;  %v1432_v38 = vadd.f32 1.0, %v1853_v35 }
 0x265   :  { %1866 = vrcp.f32 %v1433_v36  ;;  %v1434_v39 = vadd.f32 1.0, %v1855_v37 }
 0x266   :  { %1868 = vrcp.f32 %v1432_v38 }
 0x267   :  { %1870 = vrcp.f32 %v1434_v39 }
 0x269   :  { %v1857_v40 = vpop.eup %1856 }
 0x26a   :  { %1471 = vst [vmem:[#allocation8 + $0x20] sm:$0xff] %v1857_v40 }
 0x26b   :  { %v1859_v41 = vpop.eup %1858 }
 0x26c   :  { %v1861_v42 = vpop.eup %1860  ;;  %1473 = vst [vmem:[#allocation8 + $0x30] sm:$0xff] %v1859_v41 }
 0x26d   :  { %v1863_v43 = vpop.eup %1862  ;;  %1472 = vst [vmem:[#allocation8 + $0x28] sm:$0xff] %v1861_v42 }
 0x26e   :  { %v1865_v44 = vpop.eup %1864  ;;  %1474 = vst [vmem:[#allocation8 + $0x38] sm:$0xff] %v1863_v43 }
 0x26f   :  { %v1867_v45 = vpop.eup %1866  ;;  %1479 = vst [vmem:[#allocation8 + $0x60] sm:$0xff] %v1865_v44 }
 0x270   :  { %v1869_v46 = vpop.eup %1868  ;;  %1481 = vst [vmem:[#allocation8 + $0x70] sm:$0xff] %v1867_v45 }
 0x271   :  { %v1871_v47 = vpop.eup %1870  ;;  %1480 = vst [vmem:[#allocation8 + $0x68] sm:$0xff] %v1869_v46 }
 0x272   :  { %1482 = vst [vmem:[#allocation8 + $0x78] sm:$0xff] %v1871_v47 }
 0x273   :  { %1949 = shalt.err (!%p1946_p0)
}
 0x274   :  { %s1950_s14 = scalar_lea.hbm %s2103_s5, 2048 }
 0x275   :  { %p1951_p1 = scmp.ne.s32.totalorder %s2103_s5, %s1950_s14  ;;  %p1954_p2 = scmp.lt.u32.totalorder %s1950_s14, %s2103_s5 }
 0x277   :  { %p1956_p3 = pnand %p1954_p2, %p1951_p1 }
 0x279   :  { %1959 = shalt.err (!%p1956_p3)
}
 0x27a   :  { %1494 = dma.vmem_to_hbm [thread:$0]  %s1489_s10, 2048, %s2103_s5, [#allocation4], %s1970_s1, %s1970_s1, %s1967_s28  }
 0x27b   :  { %1964 = dma.done.wait [#allocation4], 2048  }
 0x27c   :  { %1965 = vsyncadd [#allocation4], 4294965248 }
 0x27d   :  { %1498 = vsyncpa [#allocation3], 1 }
 0x27e   :  { %1499 = vsyncpa [#allocation6], 1 }
 0x27f   :  { %1500 = vsyncpa [#allocation4], 1 }

// kernel: tpu_custom_call.1
= control target key start
LH: loop header
LB: loop body
LE: loop exit
PB: predicated region body
PF: predicated region fallthrough
CT: control target
= control target key end

     0   :  { %10 = vsyncpa [#allocation3], 0  ;;  %s2098_s0 = inlined_call_operand.hbm [shape: f32[16,1024], index: 0, kind: input, shape index: {}]   ;;  %s2099_s1 = inlined_call_operand.hbm [shape: bf16[1024,128], index: 1, kind: input, shape index: {}]   ;;  %s2100_s2 = inlined_call_operand.vmem [shape: f32[1,128], index: 2, kind: input, shape index: {}]   ;;  %s2101_s3 = inlined_call_operand.hbm [shape: bf16[128,1024], index: 3, kind: input, shape index: {}]   ;;  %s2102_s4 = inlined_call_operand.vmem [shape: f32[1,1024], index: 4, kind: input, shape index: {}]   ;;  %s2103_s5 = inlined_call_operand.hbm [shape: f32[16,1024], index: 5, kind: output, shape index: {}]  }
   0x1   :  { %11 = vsyncpa [#allocation6], 0 }
   0x2   :  { %12 = vsyncpa [#allocation4], 0  ;;  %s1966_s18 = smov [#allocation5]   ;;  %s1872_s22 = scalar_lea.hbm %s2099_s1, 8192 }
   0x3   :  { %s30_s19 = sshll.u32 %s1966_s18, 4  ;;  %p1873_p0 = scmp.ne.s32.totalorder %s2099_s1, %s1872_s22  ;;  %s31_s19 = int_to_ptr.vmem [resolvable:$true] %s30_s19 }
   0x4   :  { %p1876_p1 = scmp.lt.u32.totalorder %s1872_s22, %s2099_s1 }
   0x6   :  { %p1878_p2 = pnand %p1876_p1, %p1873_p0 }
   0x8   :  { %1881 = shalt.err (!%p1878_p2)
}
   0x9   :  { %s1882_s27 = scalar_lea.vmem %s31_s19, 8192  ;;  %p1887_p4 = scmp.lt.s32.totalorder %s31_s19, %s31_s19 }
   0xa   :  { %p1883_p3 = scmp.ne.s32.totalorder %s31_s19, %s1882_s27  ;;  %p1888_p5 = scmp.lt.s32.totalorder %s1882_s27, %s1882_s27 }
   0xc   :  { %p1889_p6 = por %p1888_p5, %p1887_p4 }
   0xe   :  { %p1890_p7 = pnand %p1889_p6, %p1883_p3 }
  0x10   :  { %1893 = shalt.err (!%p1890_p7)
}
  0x11   :  { %s1967_s28 = smov 64   ;;  %s1968_s29 = smov 4  }
  0x12   :  { %36 = dma.hbm_to_vmem [thread:$0]  %s2099_s1, 8192, %s31_s19, [#allocation6], %s1967_s28, %s1967_s28, %s1968_s29  }
  0x13   :  { %s1969_s7 = smov [#allocation2]   ;;  %s1894_s11 = scalar_lea.hbm %s2098_s0, 2048 }
  0x14   :  { %s18_s8 = sshll.u32 %s1969_s7, 4  ;;  %p1895_p8 = scmp.ne.s32.totalorder %s2098_s0, %s1894_s11  ;;  %s19_s8 = int_to_ptr.vmem [resolvable:$true] %s18_s8 }
  0x15   :  { %p1898_p9 = scmp.lt.u32.totalorder %s1894_s11, %s2098_s0 }
  0x17   :  { %p1900_p10 = pnand %p1898_p9, %p1895_p8 }
  0x19   :  { %1903 = shalt.err (!%p1900_p10)
}
  0x1a   :  { %s1904_s16 = scalar_lea.vmem %s19_s8, 2048  ;;  %p1909_p12 = scmp.lt.s32.totalorder %s19_s8, %s19_s8 }
  0x1b   :  { %p1905_p11 = scmp.ne.s32.totalorder %s19_s8, %s1904_s16  ;;  %p1910_p13 = scmp.lt.s32.totalorder %s1904_s16, %s1904_s16 }
  0x1d   :  { %p1911_p0 = por %p1910_p13, %p1909_p12 }
  0x1f   :  { %p1912_p1 = pnand %p1911_p0, %p1905_p11 }
  0x21   :  { %1915 = shalt.err (!%p1912_p1)
}
  0x22   :  { %s1970_s1 = smov 1024   ;;  %s1971_s19 = smov [#allocation7]  }
  0x23   :  { %24 = dma.hbm_to_vmem [thread:$0]  %s2098_s0, 2048, %s19_s8, [#allocation3], %s1970_s1, %s1970_s1, %s1967_s28  }
  0x24   :  { %s44_s20 = sshll.u32 %s1971_s19, 4  ;;  %s1916_s23 = scalar_lea.hbm %s2101_s3, 8192  ;;  %s45_s20 = int_to_ptr.vmem [resolvable:$true] %s44_s20 }
  0x25   :  { %p1917_p2 = scmp.ne.s32.totalorder %s2101_s3, %s1916_s23  ;;  %p1920_p3 = scmp.lt.u32.totalorder %s1916_s23, %s2101_s3 }
  0x27   :  { %p1922_p4 = pnand %p1920_p3, %p1917_p2 }
  0x29   :  { %1925 = shalt.err (!%p1922_p4)
}
  0x2a   :  { %s1926_s29 = scalar_lea.vmem %s45_s20, 8192  ;;  %p1931_p6 = scmp.lt.s32.totalorder %s45_s20, %s45_s20 }
  0x2b   :  { %p1927_p5 = scmp.ne.s32.totalorder %s45_s20, %s1926_s29  ;;  %p1932_p7 = scmp.lt.s32.totalorder %s1926_s29, %s1926_s29 }
  0x2d   :  { %p1933_p8 = por %p1932_p7, %p1931_p6 }
  0x2f   :  { %p1934_p9 = pnand %p1933_p8, %p1927_p5 }
  0x31   :  { %1937 = shalt.err (!%p1934_p9)
}
  0x32   :  { %s1972_s0 = smov 512   ;;  %s1973_s30 = smov 32  }
  0x33   :  { %50 = dma.hbm_to_vmem [thread:$0]  %s2101_s3, 8192, %s45_s20, [#allocation6], %s1972_s0, %s1972_s0, %s1973_s30  }
  0x34   :  { %1960 = dma.done.wait [#allocation3], 2048  }
  0x35   :  { %1961 = vsyncadd [#allocation3], 4294965248 }
  0x36   :  { %1962 = dma.done.wait [#allocation6], 16384  }
  0x37   :  { %1963 = vsyncadd [#allocation6], 4294950912  ;;  %v1744_v0 = vld [vmem:[#allocation5 + $0x40] sm:$0xff]   ;;  %v1748_v4 = vld [vmem:[#allocation5 + $0x48] sm:$0xff]  }
  0x38   :  { %v1745_v1 = vld [vmem:[#allocation5 + $0xc0] sm:$0xff]   ;;  %1646 = vmatprep.subr.bf16.mxu0 %v1744_v0  ;;  %v1749_v5 = vld [vmem:[#allocation5 + $0xc8] sm:$0xff]   ;;  %v1752_v8 = vld [vmem:[#allocation5 + $0x50] sm:$0xff]  }
  0x39   :  { %v1746_v2 = vld [vmem:[#allocation5] sm:$0xff]   ;;  %1668 = vmatprep.subr.bf16.mxu1 %v1745_v1  ;;  %v1750_v6 = vld [vmem:[#allocation5 + $0x8] sm:$0xff]   ;;  %v1753_v9 = vld [vmem:[#allocation5 + $0xd0] sm:$0xff]  }
  0x3a   :  { %v1747_v3 = vld [vmem:[#allocation5 + $0x80] sm:$0xff]   ;;  %1647 = vmatpush3.bf16.msra.mxu0 %v1746_v2  ;;  %v1751_v7 = vld [vmem:[#allocation5 + $0x88] sm:$0xff]   ;;  %v1754_v10 = vld [vmem:[#allocation5 + $0x10] sm:$0xff]  }
  0x3b   :  { %1669 = vmatpush3.bf16.msra.mxu1 %v1747_v3  ;;  %1648 = vmatprep.subr.bf16.mxu0 %v1748_v4  ;;  %v1755_v11 = vld [vmem:[#allocation5 + $0x90] sm:$0xff]   ;;  %v1756_v12 = vld [vmem:[#allocation5 + $0x58] sm:$0xff]   ;;  %v1760_v16 = vld [vmem:[#allocation5 + $0x60] sm:$0xff]  }
  0x3c   :  { %1670 = vmatprep.subr.bf16.mxu1 %v1749_v5  ;;  %v1757_v13 = vld [vmem:[#allocation5 + $0xd8] sm:$0xff]   ;;  %v1761_v17 = vld [vmem:[#allocation5 + $0xe0] sm:$0xff]   ;;  %v1764_v20 = vld [vmem:[#allocation5 + $0x68] sm:$0xff]  }
  0x3d   :  { %v1758_v14 = vld [vmem:[#allocation5 + $0x18] sm:$0xff]   ;;  %v1762_v18 = vld [vmem:[#allocation5 + $0x20] sm:$0xff]   ;;  %v1765_v21 = vld [vmem:[#allocation5 + $0xe8] sm:$0xff]  }
  0x3e   :  { %1649 = vmatpush3.bf16.msra.mxu0 %v1750_v6  ;;  %v1759_v15 = vld [vmem:[#allocation5 + $0x98] sm:$0xff]   ;;  %v1763_v19 = vld [vmem:[#allocation5 + $0xa0] sm:$0xff]   ;;  %v1766_v22 = vld [vmem:[#allocation5 + $0x28] sm:$0xff]  }
  0x3f   :  { %1671 = vmatpush3.bf16.msra.mxu1 %v1751_v7  ;;  %1650 = vmatprep.subr.bf16.mxu0 %v1752_v8  ;;  %v1767_v23 = vld [vmem:[#allocation5 + $0xa8] sm:$0xff]   ;;  %v1768_v24 = vld [vmem:[#allocation5 + $0x70] sm:$0xff]   ;;  %v1772_v28 = vld [vmem:[#allocation5 + $0x78] sm:$0xff]  }
  0x40   :  { %1672 = vmatprep.subr.bf16.mxu1 %v1753_v9  ;;  %v1769_v25 = vld [vmem:[#allocation5 + $0xf0] sm:$0xff]   ;;  %v1773_v29 = vld [vmem:[#allocation5 + $0xf8] sm:$0xff]   ;;  %v64_v32 = vld [vmem:[#allocation2 + $0x8] sm:$0xff] }
  0x41   :  { %v1770_v26 = vld [vmem:[#allocation5 + $0x30] sm:$0xff]   ;;  %v1774_v30 = vld [vmem:[#allocation5 + $0x38] sm:$0xff]   ;;  %v72_v33 = vld [vmem:[#allocation2 + $0x48] sm:$0xff] }
  0x42   :  { %1651 = vmatpush3.bf16.msra.mxu0 %v1754_v10  ;;  %v1771_v27 = vld [vmem:[#allocation5 + $0xb0] sm:$0xff]   ;;  %v1775_v31 = vld [vmem:[#allocation5 + $0xb8] sm:$0xff]   ;;  %v80_v35 = vpack.c.bf16 %v72_v33, %v64_v32  ;;  %v63_v37 = vld [vmem:[#allocation2] sm:$0xff] }
  0x43   :  { %1673 = vmatpush3.bf16.msra.mxu1 %v1755_v11  ;;  %1652 = vmatprep.subr.bf16.mxu0 %v1756_v12  ;;  %v66_v34 = vld [vmem:[#allocation2 + $0x18] sm:$0xff]  ;;  %v71_v38 = vld [vmem:[#allocation2 + $0x40] sm:$0xff]  ;;  %v65_v41 = vld [vmem:[#allocation2 + $0x10] sm:$0xff] }
  0x44   :  { %1674 = vmatprep.subr.bf16.mxu1 %v1757_v13  ;;  %v74_v36 = vld [vmem:[#allocation2 + $0x58] sm:$0xff]  ;;  %v79_v40 = vpack.c.bf16 %v71_v38, %v63_v37  ;;  %v73_v42 = vld [vmem:[#allocation2 + $0x50] sm:$0xff]  ;;  %638 = vmatprep.mubr.bf16.mxu0 %v80_v35  ;;  %v1776_v44 = vld [vmem:[#allocation5 + $0x140] sm:$0xff]  }
  0x45   :  { %v82_v39 = vpack.c.bf16 %v74_v36, %v66_v34  ;;  %v81_v43 = vpack.c.bf16 %v73_v42, %v65_v41  ;;  %v1777_v45 = vld [vmem:[#allocation5 + $0x1c0] sm:$0xff]   ;;  %v1780_v48 = vld [vmem:[#allocation5 + $0x148] sm:$0xff]   ;;  %v1784_v52 = vld [vmem:[#allocation5 + $0x150] sm:$0xff]  }
  0x46   :  { %1653 = vmatpush3.bf16.msra.mxu0 %v1758_v14  ;;  %v1778_v46 = vld [vmem:[#allocation5 + $0x100] sm:$0xff]   ;;  %v1781_v49 = vld [vmem:[#allocation5 + $0x1c8] sm:$0xff]   ;;  %v1785_v53 = vld [vmem:[#allocation5 + $0x1d0] sm:$0xff]  }
  0x47   :  { %1675 = vmatpush3.bf16.msra.mxu1 %v1759_v15  ;;  %1654 = vmatprep.subr.bf16.mxu0 %v1760_v16  ;;  %v1779_v47 = vld [vmem:[#allocation5 + $0x180] sm:$0xff]   ;;  %v1782_v50 = vld [vmem:[#allocation5 + $0x108] sm:$0xff]   ;;  %v1786_v54 = vld [vmem:[#allocation5 + $0x110] sm:$0xff]  }
  0x48   :  { %1676 = vmatprep.subr.bf16.mxu1 %v1761_v17  ;;  %679 = vmatprep.mubr.bf16.mxu1 %v82_v39  ;;  %v1783_v51 = vld [vmem:[#allocation5 + $0x188] sm:$0xff]   ;;  %v1787_v55 = vld [vmem:[#allocation5 + $0x190] sm:$0xff]   ;;  %v1788_v56 = vld [vmem:[#allocation5 + $0x158] sm:$0xff]  }
  0x49   :  { %v1789_v57 = vld [vmem:[#allocation5 + $0x1d8] sm:$0xff]   ;;  %v1792_v60 = vld [vmem:[#allocation5 + $0x160] sm:$0xff]   ;;  %v1796_v0 = vld [vmem:[#allocation5 + $0x168] sm:$0xff]  }
  0x4a   :  { %1655 = vmatpush3.bf16.msra.mxu0 %v1762_v18  ;;  %v1790_v58 = vld [vmem:[#allocation5 + $0x118] sm:$0xff]   ;;  %v1793_v61 = vld [vmem:[#allocation5 + $0x1e0] sm:$0xff]   ;;  %v1797_v1 = vld [vmem:[#allocation5 + $0x1e8] sm:$0xff]  }
  0x4b   :  { %1677 = vmatpush3.bf16.msra.mxu1 %v1763_v19  ;;  %1656 = vmatprep.subr.bf16.mxu0 %v1764_v20  ;;  %v1791_v59 = vld [vmem:[#allocation5 + $0x198] sm:$0xff]   ;;  %v1794_v62 = vld [vmem:[#allocation5 + $0x120] sm:$0xff]   ;;  %v1798_v2 = vld [vmem:[#allocation5 + $0x128] sm:$0xff]  }
  0x4c   :  { %1678 = vmatprep.subr.bf16.mxu1 %v1765_v21  ;;  %v1795_v63 = vld [vmem:[#allocation5 + $0x1a0] sm:$0xff]   ;;  %v1799_v3 = vld [vmem:[#allocation5 + $0x1a8] sm:$0xff]   ;;  %v1800_v4 = vld [vmem:[#allocation5 + $0x170] sm:$0xff]  }
  0x4d   :  { %v1801_v5 = vld [vmem:[#allocation5 + $0x1f0] sm:$0xff]   ;;  %v1804_v8 = vld [vmem:[#allocation5 + $0x178] sm:$0xff]   ;;  %v68_v12 = vld [vmem:[#allocation2 + $0x28] sm:$0xff] }
  0x4e   :  { %1657 = vmatpush3.bf16.msra.mxu0 %v1766_v22  ;;  %v1802_v6 = vld [vmem:[#allocation5 + $0x130] sm:$0xff]   ;;  %v1805_v9 = vld [vmem:[#allocation5 + $0x1f8] sm:$0xff]   ;;  %v76_v13 = vld [vmem:[#allocation2 + $0x68] sm:$0xff] }
  0x4f   :  { %1679 = vmatpush3.bf16.msra.mxu1 %v1767_v23  ;;  %1658 = vmatprep.subr.bf16.mxu0 %v1768_v24  ;;  %v1803_v7 = vld [vmem:[#allocation5 + $0x1b0] sm:$0xff]   ;;  %v1806_v10 = vld [vmem:[#allocation5 + $0x138] sm:$0xff]   ;;  %v84_v16 = vpack.c.bf16 %v76_v13, %v68_v12  ;;  %v67_v18 = vld [vmem:[#allocation2 + $0x20] sm:$0xff] }
  0x50   :  { %1680 = vmatprep.subr.bf16.mxu1 %v1769_v25  ;;  %v1807_v11 = vld [vmem:[#allocation5 + $0x1b8] sm:$0xff]   ;;  %v75_v19 = vld [vmem:[#allocation2 + $0x60] sm:$0xff]  ;;  %v69_v20 = vld [vmem:[#allocation2 + $0x30] sm:$0xff] }
  0x51   :  { %v70_v14 = vld [vmem:[#allocation2 + $0x38] sm:$0xff]  ;;  %v83_v21 = vpack.c.bf16 %v75_v19, %v67_v18  ;;  %v77_v22 = vld [vmem:[#allocation2 + $0x70] sm:$0xff]  ;;  %v773_v24 = vld [vmem:[#allocation7] sm:$0xff] }
  0x52   :  { %1659 = vmatpush3.bf16.msra.mxu0 %v1770_v26  ;;  %v78_v15 = vld [vmem:[#allocation2 + $0x78] sm:$0xff]  ;;  %v85_v23 = vpack.c.bf16 %v77_v22, %v69_v20  ;;  %v777_v25 = vld [vmem:[#allocation7 + $0x20] sm:$0xff]  ;;  %v774_v26 = vld [vmem:[#allocation7 + $0x8] sm:$0xff] }
  0x53   :  { %1681 = vmatpush3.bf16.msra.mxu1 %v1771_v27  ;;  %1660 = vmatprep.subr.bf16.mxu0 %v1772_v28  ;;  %v86_v17 = vpack.c.bf16 %v78_v15, %v70_v14  ;;  %v1566_v27 = vcombine.low %v773_v24, %v777_v25  ;;  %v1567_v28 = vcombine.high %v773_v24, %v777_v25  ;;  %v782_v35 = vld [vmem:[#allocation7 + $0x48] sm:$0xff]  ;;  %v789_v37 = vld [vmem:[#allocation7 + $0x80] sm:$0xff]  ;;  %v775_v24 = vld [vmem:[#allocation7 + $0x10] sm:$0xff] }
  0x54   :  { %1682 = vmatprep.subr.bf16.mxu1 %v1773_v29  ;;  %v778_v29 = vld [vmem:[#allocation7 + $0x28] sm:$0xff]  ;;  %v793_v39 = vld [vmem:[#allocation7 + $0xa0] sm:$0xff]  ;;  %v779_v25 = vld [vmem:[#allocation7 + $0x30] sm:$0xff] }
  0x55   :  { %v1568_v32 = vcombine.low %v774_v26, %v778_v29  ;;  %v1569_v33 = vcombine.high %v774_v26, %v778_v29  ;;  %v786_v36 = vld [vmem:[#allocation7 + $0x68] sm:$0xff]  ;;  %v776_v26 = vld [vmem:[#allocation7 + $0x18] sm:$0xff] }
  0x56   :  { %1661 = vmatpush3.bf16.msra.mxu0 %v1774_v30  ;;  %v781_v30 = vld [vmem:[#allocation7 + $0x40] sm:$0xff]  ;;  %v1577_v38 = vcombine.high %v782_v35, %v786_v36  ;;  %v794_v41 = vld [vmem:[#allocation7 + $0xa8] sm:$0xff]  ;;  %v780_v29 = vld [vmem:[#allocation7 + $0x38] sm:$0xff] }
  0x57   :  { %1683 = vmatpush3.bf16.msra.mxu1 %v1775_v31  ;;  %1690 = vmatprep.subr.bf16.mxu0 %v1776_v44  ;;  %v785_v31 = vld [vmem:[#allocation7 + $0x60] sm:$0xff]  ;;  %v1583_v44 = vcombine.high %v789_v37, %v793_v39  ;;  %v826_v12 = vld [vmem:[#allocation7 + $0x1a8] sm:$0xff] }
  0x58   :  { %1712 = vmatprep.subr.bf16.mxu1 %v1777_v45  ;;  %v1575_v34 = vcombine.high %v781_v30, %v785_v31  ;;  %v1574_v42 = vcombine.low %v781_v30, %v785_v31  ;;  %v830_v18 = vld [vmem:[#allocation7 + $0x1c8] sm:$0xff]  ;;  %v1974_v30 = vmov 0   ;;  %v1572_v31 = vcombine.low %v776_v26, %v780_v29 }
  0x59   :  { %639 = vmatmul.mubr.bf16.vlgmr.msra.gmra.mrb[0].mxu0 %v79_v40  ;;  %v790_v40 = vld [vmem:[#allocation7 + $0x88] sm:$0xff] }
  0x5a   :  { %680 = vmatmul.mubr.bf16.vlgmr.msra.gmra.mrb[0].mxu1 %v81_v43  ;;  %1691 = vmatpush3.bf16.msra.mxu0 %v1778_v46  ;;  %v1576_v43 = vcombine.low %v782_v35, %v786_v36  ;;  %v1585_v45 = vcombine.high %v790_v40, %v794_v41  ;;  %v797_v46 = vld [vmem:[#allocation7 + $0xc0] sm:$0xff]  ;;  %v834_v20 = vld [vmem:[#allocation7 + $0x1e8] sm:$0xff] }
  0x5b   :  { %1713 = vmatpush3.bf16.msra.mxu1 %v1779_v47  ;;  %1692 = vmatprep.subr.bf16.mxu0 %v1780_v48  ;;  %v801_v47 = vld [vmem:[#allocation7 + $0xe0] sm:$0xff]  ;;  %v798_v48 = vld [vmem:[#allocation7 + $0xc8] sm:$0xff]  ;;  %v1624_v22 = vcombine.low %v830_v18, %v834_v20 }
  0x5c   :  { %1714 = vmatprep.subr.bf16.mxu1 %v1781_v49  ;;  %720 = vmatprep.mubr.bf16.mxu0 %v84_v16  ;;  %v802_v49 = vld [vmem:[#allocation7 + $0xe8] sm:$0xff]  ;;  %v829_v16 = vld [vmem:[#allocation7 + $0x1c0] sm:$0xff] }
  0x5d   :  { %761 = vmatprep.mubr.bf16.mxu1 %v86_v17  ;;  %v833_v17 = vld [vmem:[#allocation7 + $0x1e0] sm:$0xff] }
  0x5e   :  { %1693 = vmatpush3.bf16.msra.mxu0 %v1782_v50  ;;  %v1582_v50 = vcombine.low %v789_v37, %v793_v39  ;;  %v1623_v19 = vcombine.high %v829_v16, %v833_v17  ;;  %v1501_v35 = vld [vmem:[%s2100_s2] ss:$0 sm:$0xff] }
  0x5f   :  { %1715 = vmatpush3.bf16.msra.mxu1 %v1783_v51  ;;  %1694 = vmatprep.subr.bf16.mxu0 %v1784_v52  ;;  %v1584_v51 = vcombine.low %v790_v40, %v794_v41  ;;  %v1591_v52 = vcombine.high %v797_v46, %v801_v47 }
  0x60   :  { %1716 = vmatprep.subr.bf16.mxu1 %v1785_v53  ;;  %v1593_v53 = vcombine.high %v798_v48, %v802_v49 }
  0x62   :  { %1695 = vmatpush3.bf16.msra.mxu0 %v1786_v54  ;;  %v805_v54 = vld [vmem:[#allocation7 + $0x100] sm:$0xff] }
  0x63   :  { %1717 = vmatpush3.bf16.msra.mxu1 %v1787_v55  ;;  %1696 = vmatprep.subr.bf16.mxu0 %v1788_v56  ;;  %v809_v55 = vld [vmem:[#allocation7 + $0x120] sm:$0xff]  ;;  %v806_v56 = vld [vmem:[#allocation7 + $0x108] sm:$0xff] }
  0x64   :  { %1718 = vmatprep.subr.bf16.mxu1 %v1789_v57  ;;  %v810_v57 = vld [vmem:[#allocation7 + $0x128] sm:$0xff] }
  0x66   :  { %1697 = vmatpush3.bf16.msra.mxu0 %v1790_v58  ;;  %v1590_v58 = vcombine.low %v797_v46, %v801_v47 }
  0x67   :  { %1719 = vmatpush3.bf16.msra.mxu1 %v1791_v59  ;;  %1698 = vmatprep.subr.bf16.mxu0 %v1792_v60  ;;  %v1592_v59 = vcombine.low %v798_v48, %v802_v49  ;;  %v1599_v60 = vcombine.high %v805_v54, %v809_v55 }
  0x68   :  { %1720 = vmatprep.subr.bf16.mxu1 %v1793_v61  ;;  %v1601_v61 = vcombine.high %v806_v56, %v810_v57 }
  0x6a   :  { %1699 = vmatpush3.bf16.msra.mxu0 %v1794_v62  ;;  %v1598_v62 = vcombine.low %v805_v54, %v809_v55 }
  0x6b   :  { %1721 = vmatpush3.bf16.msra.mxu1 %v1795_v63  ;;  %1700 = vmatprep.subr.bf16.mxu0 %v1796_v0  ;;  %v1600_v63 = vcombine.low %v806_v56, %v810_v57  ;;  %v813_v0 = vld [vmem:[#allocation7 + $0x140] sm:$0xff] }
  0x6c   :  { %1722 = vmatprep.subr.bf16.mxu1 %v1797_v1  ;;  %v817_v1 = vld [vmem:[#allocation7 + $0x160] sm:$0xff] }
  0x6e   :  { %1701 = vmatpush3.bf16.msra.mxu0 %v1798_v2  ;;  %v814_v2 = vld [vmem:[#allocation7 + $0x148] sm:$0xff] }
  0x6f   :  { %1723 = vmatpush3.bf16.msra.mxu1 %v1799_v3  ;;  %1702 = vmatprep.subr.bf16.mxu0 %v1800_v4  ;;  %v1607_v3 = vcombine.high %v813_v0, %v817_v1  ;;  %v818_v4 = vld [vmem:[#allocation7 + $0x168] sm:$0xff] }
  0x70   :  { %1724 = vmatprep.subr.bf16.mxu1 %v1801_v5  ;;  %v1606_v5 = vcombine.low %v813_v0, %v817_v1 }
  0x72   :  { %1703 = vmatpush3.bf16.msra.mxu0 %v1802_v6  ;;  %v1608_v6 = vcombine.low %v814_v2, %v818_v4 }
  0x73   :  { %1725 = vmatpush3.bf16.msra.mxu1 %v1803_v7  ;;  %1704 = vmatprep.subr.bf16.mxu0 %v1804_v8  ;;  %v1609_v7 = vcombine.high %v814_v2, %v818_v4  ;;  %v821_v8 = vld [vmem:[#allocation7 + $0x180] sm:$0xff]  ;;  %v783_v2 = vld [vmem:[#allocation7 + $0x50] sm:$0xff]  ;;  %v784_v4 = vld [vmem:[#allocation7 + $0x58] sm:$0xff] }
  0x74   :  { %1726 = vmatprep.subr.bf16.mxu1 %v1805_v9  ;;  %v825_v9 = vld [vmem:[#allocation7 + $0x1a0] sm:$0xff] }
  0x75   :  { %v1614_v13 = vcombine.low %v821_v8, %v825_v9 }
  0x76   :  { %1705 = vmatpush3.bf16.msra.mxu0 %v1806_v10  ;;  %v822_v10 = vld [vmem:[#allocation7 + $0x188] sm:$0xff] }
  0x77   :  { %1727 = vmatpush3.bf16.msra.mxu1 %v1807_v11  ;;  %1199 = vmatprep.subr.bf16.mxu0 %v1567_v28  ;;  %v1615_v11 = vcombine.high %v821_v8, %v825_v9  ;;  %v1616_v14 = vcombine.low %v822_v10, %v826_v12  ;;  %v1617_v15 = vcombine.high %v822_v10, %v826_v12  ;;  %v795_v12 = vld [vmem:[#allocation7 + $0xb0] sm:$0xff] }
  0x78   :  { %1242 = vmatprep.subr.bf16.mxu1 %v1569_v33  ;;  %v1571_v28 = vcombine.high %v775_v24, %v779_v25 }
  0x79   :  { %721 = vmatmul.mubr.bf16.vlgmr.msra.gmra.mrb[4].mxu0 %v83_v21  ;;  %v1622_v21 = vcombine.low %v829_v16, %v833_v17 }
  0x7a   :  { %762 = vmatmul.mubr.bf16.vlgmr.msra.gmra.mrb[4].mxu1 %v85_v23  ;;  %1200 = vmatpush1.bf16.msra.mxu0 %v1566_v27  ;;  %v1625_v23 = vcombine.high %v830_v18, %v834_v20  ;;  %v1570_v27 = vcombine.low %v775_v24, %v779_v25  ;;  %v803_v20 = vld [vmem:[#allocation7 + $0xf0] sm:$0xff] }
  0x7b   :  { %1243 = vmatpush1.bf16.msra.mxu1 %v1568_v32  ;;  %1201 = vmatprep.subr.bf16.mxu0 %v1575_v34  ;;  %v1573_v32 = vcombine.high %v776_v26, %v780_v29  ;;  %v808_v29 = vld [vmem:[#allocation7 + $0x118] sm:$0xff] }
  0x7c   :  { %1244 = vmatprep.subr.bf16.mxu1 %v1577_v38  ;;  %1231 = vmatprep.mubr.bf16.mxu0 %v1974_v30 }
  0x7d   :  { %1274 = vmatprep.mubr.bf16.mxu1 %v1974_v30 }
  0x7e   :  { %1202 = vmatpush1.bf16.msra.mxu0 %v1574_v42 }
  0x7f   :  { %1245 = vmatpush1.bf16.msra.mxu1 %v1576_v43  ;;  %1203 = vmatprep.subr.bf16.mxu0 %v1583_v44 }
  0x80   :  { %1246 = vmatprep.subr.bf16.mxu1 %v1585_v45 }
  0x82   :  { %1204 = vmatpush1.bf16.msra.mxu0 %v1582_v50 }
  0x83   :  { %1247 = vmatpush1.bf16.msra.mxu1 %v1584_v51  ;;  %1205 = vmatprep.subr.bf16.mxu0 %v1591_v52 }
  0x84   :  { %1248 = vmatprep.subr.bf16.mxu1 %v1593_v53 }
  0x86   :  { %1206 = vmatpush1.bf16.msra.mxu0 %v1590_v58 }
  0x87   :  { %1249 = vmatpush1.bf16.msra.mxu1 %v1592_v59  ;;  %1207 = vmatprep.subr.bf16.mxu0 %v1599_v60 }
  0x88   :  { %1250 = vmatprep.subr.bf16.mxu1 %v1601_v61 }
  0x8a   :  { %1208 = vmatpush1.bf16.msra.mxu0 %v1598_v62 }
  0x8b   :  { %1251 = vmatpush1.bf16.msra.mxu1 %v1600_v63  ;;  %1209 = vmatprep.subr.bf16.mxu0 %v1607_v3  ;;  %v787_v3 = vld [vmem:[#allocation7 + $0x70] sm:$0xff] }
  0x8c   :  { %1252 = vmatprep.subr.bf16.mxu1 %v1609_v7  ;;  %v1579_v9 = vcombine.high %v783_v2, %v787_v3 }
  0x8e   :  { %1210 = vmatpush1.bf16.msra.mxu0 %v1606_v5  ;;  %v788_v5 = vld [vmem:[#allocation7 + $0x78] sm:$0xff] }
  0x8f   :  { %1253 = vmatpush1.bf16.msra.mxu1 %v1608_v6  ;;  %1211 = vmatprep.subr.bf16.mxu0 %v1615_v11  ;;  %v1581_v10 = vcombine.high %v784_v4, %v788_v5  ;;  %v791_v11 = vld [vmem:[#allocation7 + $0x90] sm:$0xff]  ;;  %v1580_v16 = vcombine.low %v784_v4, %v788_v5 }
  0x90   :  { %1254 = vmatprep.subr.bf16.mxu1 %v1617_v15  ;;  %v1578_v15 = vcombine.low %v783_v2, %v787_v3  ;;  %v1587_v17 = vcombine.high %v791_v11, %v795_v12 }
  0x92   :  { %1212 = vmatpush1.bf16.msra.mxu0 %v1614_v13  ;;  %v792_v13 = vld [vmem:[#allocation7 + $0x98] sm:$0xff] }
  0x93   :  { %1255 = vmatpush1.bf16.msra.mxu1 %v1616_v14  ;;  %1213 = vmatprep.subr.bf16.mxu0 %v1623_v19  ;;  %v796_v14 = vld [vmem:[#allocation7 + $0xb8] sm:$0xff]  ;;  %v799_v19 = vld [vmem:[#allocation7 + $0xd0] sm:$0xff] }
  0x94   :  { %1256 = vmatprep.subr.bf16.mxu1 %v1625_v23  ;;  %v1589_v18 = vcombine.high %v792_v13, %v796_v14  ;;  %v1586_v23 = vcombine.low %v791_v11, %v795_v12  ;;  %v1588_v24 = vcombine.low %v792_v13, %v796_v14  ;;  %v1595_v25 = vcombine.high %v799_v19, %v803_v20 }
  0x96   :  { %1214 = vmatpush1.bf16.msra.mxu0 %v1622_v21  ;;  %v800_v21 = vld [vmem:[#allocation7 + $0xd8] sm:$0xff] }
  0x97   :  { %1257 = vmatpush1.bf16.msra.mxu1 %v1624_v22  ;;  %1285 = vmatprep.subr.bf16.mxu0 %v1571_v28  ;;  %v804_v22 = vld [vmem:[#allocation7 + $0xf8] sm:$0xff]  ;;  %v811_v28 = vld [vmem:[#allocation7 + $0x130] sm:$0xff] }
  0x98   :  { %1328 = vmatprep.subr.bf16.mxu1 %v1573_v32  ;;  %v1597_v26 = vcombine.high %v800_v21, %v804_v22  ;;  %v1594_v32 = vcombine.low %v799_v19, %v803_v20 }
 0x12c   :  { %v1662_v33 = vpop.f32.mrb[0].mxu0 }
 0x12d   :  { %v1684_v34 = vpop.f32.mrb[0].mxu1  ;;  %v1663_v36 = vpop.f32.mrb[1].mxu0 }
 0x12e   :  { %v1664_v37 = vadd.f32 %v1663_v36, %v1662_v33  ;;  %v1685_v38 = vpop.f32.mrb[1].mxu1  ;;  %v1665_v39 = vpop.f32.mrb[2].mxu0  ;;  %v1596_v33 = vcombine.low %v800_v21, %v804_v22  ;;  %v819_v36 = vld [vmem:[#allocation7 + $0x170] sm:$0xff] }
 0x12f   :  { %v1686_v40 = vadd.f32 %v1685_v38, %v1684_v34  ;;  %v1687_v41 = vpop.f32.mrb[2].mxu1  ;;  %v1666_v42 = vpop.f32.mrb[3].mxu0  ;;  %v820_v38 = vld [vmem:[#allocation7 + $0x178] sm:$0xff] }
 0x130   :  { %v641_v43 = vadd.f32 %v1664_v37, %v1501_v35  ;;  %v1667_v44 = vadd.f32 %v1666_v42, %v1665_v39  ;;  %v1688_v45 = vpop.f32.mrb[3].mxu1  ;;  %v816_v37 = vld [vmem:[#allocation7 + $0x158] sm:$0xff] }
 0x131   :  { %v1689_v46 = vadd.f32 %v1688_v45, %v1687_v41  ;;  %v1613_v42 = vcombine.high %v816_v37, %v820_v38  ;;  %v824_v45 = vld [vmem:[#allocation7 + $0x198] sm:$0xff] }
 0x132   :  { %v682_v47 = vadd.f32 %v1686_v40, %v641_v43  ;;  %v644_v48 = vadd.f32 %v1667_v44, %v1501_v35  ;;  %v815_v35 = vld [vmem:[#allocation7 + $0x150] sm:$0xff] }
 0x133   :  { %v1611_v41 = vcombine.high %v815_v35, %v819_v36  ;;  %v823_v43 = vld [vmem:[#allocation7 + $0x190] sm:$0xff] }
 0x134   :  { %v685_v49 = vadd.f32 %v1689_v46, %v644_v48  ;;  %v827_v44 = vld [vmem:[#allocation7 + $0x1b0] sm:$0xff]  ;;  %v828_v46 = vld [vmem:[#allocation7 + $0x1b8] sm:$0xff]  ;;  %v1612_v48 = vcombine.low %v816_v37, %v820_v38 }
 0x14c   :  { %v1706_v50 = vpop.f32.mrb[4].mxu0 }
 0x14d   :  { %v1728_v51 = vpop.f32.mrb[4].mxu1  ;;  %v1707_v52 = vpop.f32.mrb[5].mxu0 }
 0x14e   :  { %v1708_v53 = vadd.f32 %v1707_v52, %v1706_v50  ;;  %v1729_v54 = vpop.f32.mrb[5].mxu1  ;;  %v1709_v55 = vpop.f32.mrb[6].mxu0  ;;  %v1621_v50 = vcombine.high %v824_v45, %v828_v46  ;;  %v835_v52 = vld [vmem:[#allocation7 + $0x1f0] sm:$0xff] }
 0x14f   :  { %v1730_v56 = vadd.f32 %v1729_v54, %v1728_v51  ;;  %v1731_v57 = vpop.f32.mrb[6].mxu1  ;;  %v1710_v58 = vpop.f32.mrb[7].mxu0  ;;  %v831_v51 = vld [vmem:[#allocation7 + $0x1d0] sm:$0xff]  ;;  %v836_v54 = vld [vmem:[#allocation7 + $0x1f8] sm:$0xff] }
 0x150   :  { %v723_v59 = vadd.f32 %v1708_v53, %v682_v47  ;;  %v1711_v60 = vadd.f32 %v1710_v58, %v1709_v55  ;;  %v1732_v61 = vpop.f32.mrb[7].mxu1  ;;  %v1610_v47 = vcombine.low %v815_v35, %v819_v36  ;;  %v832_v53 = vld [vmem:[#allocation7 + $0x1d8] sm:$0xff]  ;;  %v1618_v55 = vcombine.low %v823_v43, %v827_v44 }
 0x151   :  { %v1733_v62 = vadd.f32 %v1732_v61, %v1731_v57  ;;  %v1627_v57 = vcombine.high %v831_v51, %v835_v52  ;;  %v1629_v58 = vcombine.high %v832_v53, %v836_v54  ;;  %v839_v61 = vlaneseq }
 0x152   :  { %v764_v63 = vadd.f32 %v1730_v56, %v723_v59  ;;  %v726_v0 = vadd.f32 %v1711_v60, %v685_v49  ;;  %v1619_v49 = vcombine.high %v823_v43, %v827_v44  ;;  %v1620_v56 = vcombine.low %v824_v45, %v828_v46 }
 0x153   :  { %v1626_v59 = vcombine.low %v831_v51, %v835_v52  ;;  %v1628_v60 = vcombine.low %v832_v53, %v836_v54 }
 0x154   :  { %v767_v1 = vadd.f32 %v1733_v62, %v726_v0  ;;  %v770_v6 = vmax.f32 %v764_v63, 0.0  ;;  %v2060_v62 = vshrl.u32 %v839_v61, 7 }
 0x156   :  { %v771_v7 = vmax.f32 %v767_v1, 0.0  ;;  %v841_v63 = vsub.s32 0, %v2060_v62  ;;  %v849_v0 = vsub.s32 2, %v2060_v62  ;;  %v2067_v1 = vld [vmem:[%s2102_s4] sm:$0xff]  ;;  %v845_v2 = vsub.s32 1, %v2060_v62  ;;  %s1975_s4 = smov [#allocation8]  }
 0x157   :  { %v853_v3 = vsub.s32 3, %v2060_v62  ;;  %v869_v51 = vsub.s32 7, %v2060_v62  ;;  %s1488_s10 = sshll.u32 %s1975_s4, 4  ;;  %s1489_s10 = int_to_ptr.vmem [resolvable:$true] %s1488_s10 }
 0x158   :  { %v2052_v8 = vpack.c.bf16 %v771_v7, %v770_v6  ;;  %v842_v4 = vrot.slane %v2067_v1, %v841_v63  ;;  %v850_v5 = vrot.slane %v2067_v1, %v849_v0  ;;  %v846_v6 = vrot.slane %v2067_v1, %v845_v2  ;;  %s1938_s11 = scalar_lea.vmem %s1489_s10, 2048  ;;  %p1943_p11 = scmp.lt.s32.totalorder %s1489_s10, %s1489_s10 }
 0x159   :  { %v854_v7 = vrot.slane %v2067_v1, %v853_v3  ;;  %p1939_p10 = scmp.ne.s32.totalorder %s1489_s10, %s1938_s11  ;;  %p1944_p12 = scmp.lt.s32.totalorder %s1938_s11, %s1938_s11 }
 0x15a   :  { %1232 = vmatmul.mubr.bf16.vlgmr.msra.gmra.mrb[8].mxu0 %v2052_v8  ;;  %1275 = vmatmul.mubr.bf16.vlgmr.msra.gmra.mrb[8].mxu1 %v2052_v8 }
 0x15b   :  { %1286 = vmatpush1.bf16.msra.mxu0 %v1570_v27  ;;  %1329 = vmatpush1.bf16.msra.mxu1 %v1572_v31  ;;  %v807_v27 = vld [vmem:[#allocation7 + $0x110] sm:$0xff]  ;;  %v812_v31 = vld [vmem:[#allocation7 + $0x138] sm:$0xff]  ;;  %p1945_p13 = por %p1944_p12, %p1943_p11 }
 0x15c   :  { %1287 = vmatprep.subr.bf16.mxu0 %v1579_v9  ;;  %1330 = vmatprep.subr.bf16.mxu1 %v1581_v10  ;;  %v1603_v34 = vcombine.high %v807_v27, %v811_v28  ;;  %v1602_v39 = vcombine.low %v807_v27, %v811_v28  ;;  %v1604_v40 = vcombine.low %v808_v29, %v812_v31 }
 0x15d   :  { %1317 = vmatprep.mubr.bf16.mxu0 %v1974_v30  ;;  %1360 = vmatprep.mubr.bf16.mxu1 %v1974_v30  ;;  %v1605_v30 = vcombine.high %v808_v29, %v812_v31  ;;  %p1946_p0 = pnand %p1945_p13, %p1939_p10 }
 0x15f   :  { %1288 = vmatpush1.bf16.msra.mxu0 %v1578_v15  ;;  %1331 = vmatpush1.bf16.msra.mxu1 %v1580_v16 }
 0x160   :  { %1289 = vmatprep.subr.bf16.mxu0 %v1587_v17  ;;  %1332 = vmatprep.subr.bf16.mxu1 %v1589_v18 }
 0x163   :  { %1290 = vmatpush1.bf16.msra.mxu0 %v1586_v23  ;;  %1333 = vmatpush1.bf16.msra.mxu1 %v1588_v24 }
 0x164   :  { %1291 = vmatprep.subr.bf16.mxu0 %v1595_v25  ;;  %1334 = vmatprep.subr.bf16.mxu1 %v1597_v26 }
 0x167   :  { %1292 = vmatpush1.bf16.msra.mxu0 %v1594_v32  ;;  %1335 = vmatpush1.bf16.msra.mxu1 %v1596_v33 }
 0x168   :  { %1293 = vmatprep.subr.bf16.mxu0 %v1603_v34  ;;  %1336 = vmatprep.subr.bf16.mxu1 %v1605_v30 }
 0x16b   :  { %1294 = vmatpush1.bf16.msra.mxu0 %v1602_v39  ;;  %1337 = vmatpush1.bf16.msra.mxu1 %v1604_v40 }
 0x16c   :  { %1295 = vmatprep.subr.bf16.mxu0 %v1611_v41  ;;  %1338 = vmatprep.subr.bf16.mxu1 %v1613_v42 }
 0x16f   :  { %1296 = vmatpush1.bf16.msra.mxu0 %v1610_v47  ;;  %1339 = vmatpush1.bf16.msra.mxu1 %v1612_v48  ;;  %v857_v48 = vsub.s32 4, %v2060_v62 }
 0x170   :  { %1297 = vmatprep.subr.bf16.mxu0 %v1619_v49  ;;  %1340 = vmatprep.subr.bf16.mxu1 %v1621_v50  ;;  %v865_v49 = vsub.s32 6, %v2060_v62  ;;  %v861_v50 = vsub.s32 5, %v2060_v62 }
 0x171   :  { %v858_v54 = vrot.slane %v2067_v1, %v857_v48 }
 0x173   :  { %1298 = vmatpush1.bf16.msra.mxu0 %v1618_v55  ;;  %1341 = vmatpush1.bf16.msra.mxu1 %v1620_v56  ;;  %v866_v55 = vrot.slane %v2067_v1, %v865_v49 }
 0x174   :  { %1299 = vmatprep.subr.bf16.mxu0 %v1627_v57  ;;  %1342 = vmatprep.subr.bf16.mxu1 %v1629_v58  ;;  %v862_v57 = vrot.slane %v2067_v1, %v861_v50  ;;  %v870_v58 = vrot.slane %v2067_v1, %v869_v51 }
 0x177   :  { %1300 = vmatpush1.bf16.msra.mxu0 %v1626_v59  ;;  %1343 = vmatpush1.bf16.msra.mxu1 %v1628_v60 }
 0x17a   :  { %1318 = vmatmul.mubr.bf16.vlgmr.msra.gmra.mrb[12].mxu0 %v2052_v8  ;;  %1361 = vmatmul.mubr.bf16.vlgmr.msra.gmra.mrb[12].mxu1 %v2052_v8 }
 0x22d   :  { %v1233_v8 = vpop.f32.mrb[8].mxu0  ;;  %v1276_v9 = vpop.f32.mrb[8].mxu1 }
 0x22e   :  { %v1234_v10 = vadd.f32 %v1233_v8, %v842_v4  ;;  %v1277_v11 = vadd.f32 %v1276_v9, %v850_v5  ;;  %v1235_v12 = vpop.f32.mrb[9].mxu0  ;;  %v1278_v13 = vpop.f32.mrb[9].mxu1 }
 0x22f   :  { %v1236_v14 = vadd.f32 %v1235_v12, %v846_v6  ;;  %v1279_v15 = vadd.f32 %v1278_v13, %v854_v7  ;;  %v1237_v16 = vpop.f32.mrb[10].mxu0  ;;  %v1280_v17 = vpop.f32.mrb[10].mxu1 }
 0x230   :  { %v1630_v18 = vmul.f32 -1.442695, %v1234_v10  ;;  %v1632_v19 = vmul.f32 -1.442695, %v1277_v11  ;;  %v1238_v20 = vadd.f32 %v1237_v16, %v842_v4  ;;  %v1281_v21 = vadd.f32 %v1280_v17, %v850_v5  ;;  %v1239_v22 = vpop.f32.mrb[11].mxu0  ;;  %v1282_v23 = vpop.f32.mrb[11].mxu1 }
 0x231   :  { %v1631_v24 = vmul.f32 -1.442695, %v1236_v14  ;;  %v1633_v25 = vmul.f32 -1.442695, %v1279_v15  ;;  %v1240_v26 = vadd.f32 %v1239_v22, %v846_v6  ;;  %v1283_v27 = vadd.f32 %v1282_v23, %v854_v7 }
 0x232   :  { %1808 = vpow2.f32 %v1630_v18  ;;  %v1638_v28 = vmul.f32 -1.442695, %v1238_v20  ;;  %v1640_v29 = vmul.f32 -1.442695, %v1281_v21 }
 0x233   :  { %1810 = vpow2.f32 %v1632_v19  ;;  %v1639_v31 = vmul.f32 -1.442695, %v1240_v26  ;;  %v1641_v32 = vmul.f32 -1.442695, %v1283_v27 }
 0x234   :  { %1812 = vpow2.f32 %v1631_v24 }
 0x235   :  { %1814 = vpow2.f32 %v1633_v25 }
 0x236   :  { %1816 = vpow2.f32 %v1638_v28 }
 0x237   :  { %1818 = vpow2.f32 %v1640_v29 }
 0x238   :  { %1820 = vpow2.f32 %v1639_v31 }
 0x239   :  { %1822 = vpow2.f32 %v1641_v32 }
 0x23c   :  { %v1809_v33 = vpop.eup %1808 }
 0x23d   :  { %v1811_v34 = vpop.eup %1810  ;;  %v1419_v30 = vadd.f32 1.0, %v1809_v33 }
 0x23e   :  { %v1813_v35 = vpop.eup %1812  ;;  %v1421_v36 = vadd.f32 1.0, %v1811_v34 }
 0x23f   :  { %v1815_v37 = vpop.eup %1814  ;;  %1824 = vrcp.f32 %v1419_v30  ;;  %v1420_v38 = vadd.f32 1.0, %v1813_v35 }
 0x240   :  { %v1817_v39 = vpop.eup %1816  ;;  %1826 = vrcp.f32 %v1421_v36  ;;  %v1422_v40 = vadd.f32 1.0, %v1815_v37 }
 0x241   :  { %v1819_v41 = vpop.eup %1818  ;;  %1828 = vrcp.f32 %v1420_v38  ;;  %v1427_v42 = vadd.f32 1.0, %v1817_v39 }
 0x242   :  { %v1821_v43 = vpop.eup %1820  ;;  %1830 = vrcp.f32 %v1422_v40  ;;  %v1429_v44 = vadd.f32 1.0, %v1819_v41 }
 0x243   :  { %v1823_v45 = vpop.eup %1822  ;;  %1832 = vrcp.f32 %v1427_v42  ;;  %v1428_v46 = vadd.f32 1.0, %v1821_v43 }
 0x244   :  { %1834 = vrcp.f32 %v1429_v44  ;;  %v1430_v47 = vadd.f32 1.0, %v1823_v45 }
 0x245   :  { %1836 = vrcp.f32 %v1428_v46 }
 0x246   :  { %1838 = vrcp.f32 %v1430_v47 }
 0x249   :  { %v1825_v52 = vpop.eup %1824 }
 0x24a   :  { %v1827_v53 = vpop.eup %1826  ;;  %1467 = vst [vmem:[#allocation8] sm:$0xff] %v1825_v52 }
 0x24b   :  { %v1829_v56 = vpop.eup %1828  ;;  %1469 = vst [vmem:[#allocation8 + $0x10] sm:$0xff] %v1827_v53 }
 0x24c   :  { %v1831_v59 = vpop.eup %1830  ;;  %1468 = vst [vmem:[#allocation8 + $0x8] sm:$0xff] %v1829_v56 }
 0x24d   :  { %v1833_v60 = vpop.eup %1832  ;;  %1470 = vst [vmem:[#allocation8 + $0x18] sm:$0xff] %v1831_v59  ;;  %v1319_v61 = vpop.f32.mrb[12].mxu0 }
 0x24e   :  { %v1362_v63 = vpop.f32.mrb[12].mxu1  ;;  %v1835_v62 = vpop.eup %1834  ;;  %1475 = vst [vmem:[#allocation8 + $0x40] sm:$0xff] %v1833_v60  ;;  %v1320_v0 = vadd.f32 %v1319_v61, %v858_v54 }
 0x24f   :  { %v1363_v2 = vadd.f32 %v1362_v63, %v866_v55  ;;  %v1321_v3 = vpop.f32.mrb[13].mxu0  ;;  %v1364_v4 = vpop.f32.mrb[13].mxu1  ;;  %1477 = vst [vmem:[#allocation8 + $0x50] sm:$0xff] %v1835_v62 }
 0x250   :  { %v1837_v5 = vpop.eup %1836  ;;  %v1322_v6 = vadd.f32 %v1321_v3, %v862_v57  ;;  %v1365_v7 = vadd.f32 %v1364_v4, %v870_v58  ;;  %v1323_v8 = vpop.f32.mrb[14].mxu0  ;;  %v1634_v1 = vmul.f32 -1.442695, %v1320_v0 }
 0x251   :  { %v1366_v9 = vpop.f32.mrb[14].mxu1  ;;  %v1839_v10 = vpop.eup %1838  ;;  %1476 = vst [vmem:[#allocation8 + $0x48] sm:$0xff] %v1837_v5  ;;  %v1636_v11 = vmul.f32 -1.442695, %v1363_v2  ;;  %v1324_v12 = vadd.f32 %v1323_v8, %v858_v54 }
 0x252   :  { %v1367_v13 = vadd.f32 %v1366_v9, %v866_v55  ;;  %v1325_v14 = vpop.f32.mrb[15].mxu0  ;;  %v1368_v15 = vpop.f32.mrb[15].mxu1  ;;  %1478 = vst [vmem:[#allocation8 + $0x58] sm:$0xff] %v1839_v10  ;;  %v1635_v16 = vmul.f32 -1.442695, %v1322_v6  ;;  %1840 = vpow2.f32 %v1634_v1 }
 0x253   :  { %v1637_v17 = vmul.f32 -1.442695, %v1365_v7  ;;  %v1326_v18 = vadd.f32 %v1325_v14, %v862_v57  ;;  %v1369_v19 = vadd.f32 %v1368_v15, %v870_v58  ;;  %v1642_v20 = vmul.f32 -1.442695, %v1324_v12 }
 0x254   :  { %1842 = vpow2.f32 %v1636_v11  ;;  %v1644_v21 = vmul.f32 -1.442695, %v1367_v13 }
 0x255   :  { %1844 = vpow2.f32 %v1635_v16  ;;  %v1643_v22 = vmul.f32 -1.442695, %v1326_v18  ;;  %v1645_v23 = vmul.f32 -1.442695, %v1369_v19 }
 0x256   :  { %1846 = vpow2.f32 %v1637_v17 }
 0x257   :  { %1848 = vpow2.f32 %v1642_v20 }
 0x258   :  { %1850 = vpow2.f32 %v1644_v21 }
 0x259   :  { %1852 = vpow2.f32 %v1643_v22 }
 0x25a   :  { %1854 = vpow2.f32 %v1645_v23 }
 0x25c   :  { %v1841_v24 = vpop.eup %1840 }
 0x25d   :  { %v1423_v26 = vadd.f32 1.0, %v1841_v24 }
 0x25e   :  { %v1843_v25 = vpop.eup %1842 }
 0x25f   :  { %v1845_v27 = vpop.eup %1844  ;;  %v1425_v28 = vadd.f32 1.0, %v1843_v25  ;;  %1856 = vrcp.f32 %v1423_v26 }
 0x260   :  { %v1847_v29 = vpop.eup %1846  ;;  %v1424_v31 = vadd.f32 1.0, %v1845_v27 }
 0x261   :  { %v1849_v32 = vpop.eup %1848  ;;  %1858 = vrcp.f32 %v1425_v28  ;;  %v1426_v33 = vadd.f32 1.0, %v1847_v29 }
 0x262   :  { %v1851_v34 = vpop.eup %1850  ;;  %1860 = vrcp.f32 %v1424_v31  ;;  %v1431_v30 = vadd.f32 1.0, %v1849_v32 }
 0x263   :  { %v1853_v35 = vpop.eup %1852  ;;  %1862 = vrcp.f32 %v1426_v33  ;;  %v1433_v36 = vadd.f32 1.0, %v1851_v34 }
 0x264   :  { %v1855_v37 = vpop.eup %1854  ;;  %1864 = vrcp.f32 %v1431_v30  ;;  %v1432_v38 = vadd.f32 1.0, %v1853_v35 }
 0x265   :  { %1866 = vrcp.f32 %v1433_v36  ;;  %v1434_v39 = vadd.f32 1.0, %v1855_v37 }
 0x266   :  { %1868 = vrcp.f32 %v1432_v38 }
 0x267   :  { %1870 = vrcp.f32 %v1434_v39 }
 0x269   :  { %v1857_v40 = vpop.eup %1856 }
 0x26a   :  { %1471 = vst [vmem:[#allocation8 + $0x20] sm:$0xff] %v1857_v40 }
 0x26b   :  { %v1859_v41 = vpop.eup %1858 }
 0x26c   :  { %v1861_v42 = vpop.eup %1860  ;;  %1473 = vst [vmem:[#allocation8 + $0x30] sm:$0xff] %v1859_v41 }
 0x26d   :  { %v1863_v43 = vpop.eup %1862  ;;  %1472 = vst [vmem:[#allocation8 + $0x28] sm:$0xff] %v1861_v42 }
 0x26e   :  { %v1865_v44 = vpop.eup %1864  ;;  %1474 = vst [vmem:[#allocation8 + $0x38] sm:$0xff] %v1863_v43 }
 0x26f   :  { %v1867_v45 = vpop.eup %1866  ;;  %1479 = vst [vmem:[#allocation8 + $0x60] sm:$0xff] %v1865_v44 }
 0x270   :  { %v1869_v46 = vpop.eup %1868  ;;  %1481 = vst [vmem:[#allocation8 + $0x70] sm:$0xff] %v1867_v45 }
 0x271   :  { %v1871_v47 = vpop.eup %1870  ;;  %1480 = vst [vmem:[#allocation8 + $0x68] sm:$0xff] %v1869_v46 }
 0x272   :  { %1482 = vst [vmem:[#allocation8 + $0x78] sm:$0xff] %v1871_v47 }
 0x273   :  { %1949 = shalt.err (!%p1946_p0)
}
 0x274   :  { %s1950_s14 = scalar_lea.hbm %s2103_s5, 2048 }
 0x275   :  { %p1951_p1 = scmp.ne.s32.totalorder %s2103_s5, %s1950_s14  ;;  %p1954_p2 = scmp.lt.u32.totalorder %s1950_s14, %s2103_s5 }
 0x277   :  { %p1956_p3 = pnand %p1954_p2, %p1951_p1 }
 0x279   :  { %1959 = shalt.err (!%p1956_p3)
}
 0x27a   :  { %1494 = dma.vmem_to_hbm [thread:$0]  %s1489_s10, 2048, %s2103_s5, [#allocation4], %s1970_s1, %s1970_s1, %s1967_s28  }
 0x27b   :  { %1964 = dma.done.wait [#allocation4], 2048  }
 0x27c   :  { %1965 = vsyncadd [#allocation4], 4294965248 }
 0x27d   :  { %1498 = vsyncpa [#allocation3], 1 }
 0x27e   :  { %1499 = vsyncpa [#allocation6], 1 }
 0x27f   :  { %1500 = vsyncpa [#allocation4], 1 }

</bundles_post_ra>
